<compile_context>
chip_gen: v7x
topology: tpu7x:2x2x1
jax: 0.10.0
libtpu: 0.0.40
codegen_flags: <defaults>
</compile_context>

<pallas_src>
import jax
import jax.numpy as jnp
from jax import lax
from jax.experimental import pallas as pl
from jax.experimental.pallas import tpu as pltpu


# ----------------------------------------------------------------------------
# Gram matrix  G[b] = x[b] @ x[b]^T   (MXU, one grid step per batch element).
# ----------------------------------------------------------------------------
def _gram_kernel(x_ref, g_ref):
    x = x_ref[0].astype(jnp.float32)                           # (M, N)
    # nt-form contraction ((1,), (1,)): feeds the MXU directly, no XLU transpose.
    g_ref[0] = lax.dot_general(x, x, (((1,), (1,)), ((), ())),
                               preferred_element_type=jnp.float32)


def gram_xxt(x):
    """x: (B, M, N) -> G: (B, M, M) float32."""
    B, M, N = x.shape
    # TODO(synk): for production-size M/N, tile the (M, M) output and contract
    # over an N grid axis to stay inside v7x's 64 MiB VMEM; whole per-batch
    # blocks are fine at the feature sizes this module sees.
    return pl.pallas_call(
        _gram_kernel,
        out_shape=jax.ShapeDtypeStruct((B, M, M), jnp.float32),
        grid=(B,),
        in_specs=[pl.BlockSpec((1, M, N), lambda b: (b, 0, 0))],
        out_specs=pl.BlockSpec((1, M, M), lambda b: (b, 0, 0)),
        compiler_params=pltpu.CompilerParams(
            dimension_semantics=("parallel",)),   # v7x: shard batch over 2 TCs
    )(x.astype(jnp.float32))


# ----------------------------------------------------------------------------
# Fused epilogue:  w = s3 / sum(s3);  simplex = u3 @ w   (one small kernel,
# whole working set VMEM-resident, M on lanes).
# ----------------------------------------------------------------------------
def _simplex_kernel(u3t_ref, s3_ref, o_ref):
    u3t = u3t_ref[...].astype(jnp.float32)                 # (B, 3, M)  M on lanes
    s3 = s3_ref[...].astype(jnp.float32)                   # (B, 3, 1)
    w = s3 / jnp.sum(s3, axis=1, keepdims=True)            # normalize top-3 sv
    o_ref[...] = jnp.sum(u3t * w, axis=1).astype(o_ref.dtype)   # (B, M)


def simplex_project(u3, s3):
    """u3: (B, M, 3), s3: (B, 3) -> simplex: (B, M, 1)."""
    B, M, _ = u3.shape
    u3t = jnp.transpose(u3, (0, 2, 1))                     # (B, 3, M): lane-major in M
    out = pl.pallas_call(
        _simplex_kernel,
        out_shape=jax.ShapeDtypeStruct((B, M), jnp.float32),
    )(u3t.astype(jnp.float32), s3.reshape(B, 3, 1).astype(jnp.float32))
    return out[..., None]                                  # (B, M, 1)


# ----------------------------------------------------------------------------
# PCA.forward
# ----------------------------------------------------------------------------
def pca_forward(x):
    x = x.astype(jnp.float32)
    B, M, N = x.shape
    g = gram_xxt(x)                                        # Pallas (MXU)
    # TODO(synk): symmetric eigendecomposition has no Pallas equivalent; XLA eigh.
    evals, evecs = jnp.linalg.eigh(g)                      # ascending order
    s3 = jnp.sqrt(jnp.maximum(evals[:, -3:][:, ::-1], 0.0))    # == s[:, :3] (descending)
    u3 = evecs[:, :, -3:][:, :, ::-1]                      # == u[:, :, :3] (up to sign)
    return simplex_project(u3, s3)                         # Pallas (fused epilogue)


if __name__ == "__main__":
    key = jax.random.PRNGKey(0)
    B, M, N = 2, 64, 32
    x = jax.random.normal(key, (B, M, N), jnp.float32)

    fwd = jax.jit(pca_forward)
    simplex = fwd(x)
    jax.block_until_ready(simplex)
    assert simplex.shape == (B, M, 1)
    assert bool(jnp.all(jnp.isfinite(simplex)))

    # --- kernel-level checks against pure-JAX references ---
    # Gram kernel vs XLA einsum (loose tol: einsum default matmul precision on
    # TPU may differ from the in-kernel f32 MXU multipass).
    g_ref = jnp.einsum("bmn,bkn->bmk", x, x,
                       precision=lax.Precision.HIGHEST)
    g_pal = gram_xxt(x)
    assert bool(jnp.allclose(g_pal, g_ref, rtol=1e-2, atol=1e-2)), \
        float(jnp.max(jnp.abs(g_pal - g_ref)))

    # Fused projection kernel vs pure-JAX reference on identical u3/s3.
    evals, evecs = jnp.linalg.eigh(g_ref)
    s3 = jnp.sqrt(jnp.maximum(evals[:, -3:][:, ::-1], 0.0))
    u3 = evecs[:, :, -3:][:, :, ::-1]
    w = s3 / jnp.sum(s3, axis=1, keepdims=True)
    ref = jnp.einsum("bmk,bk->bm", u3, w)[..., None]
    pal = simplex_project(u3, s3)
    assert bool(jnp.allclose(pal, ref, rtol=1e-5, atol=1e-5)), \
        float(jnp.max(jnp.abs(pal - ref)))

    print("KERNEL_OK")
</pallas_src>

<mosaic_0001>
module attributes {stable_mosaic.version = 11 : i64} {
  func.func @_gram_kernel(%arg0: i32, %arg1: memref<1x64x32xf32, #tpu.memory_space<vmem>>, %arg2: memref<1x64x64xf32, #tpu.memory_space<vmem>>) attributes {dimension_semantics = [#tpu.dimension_semantics<parallel>], iteration_bounds = array<i64: 2>, scalar_prefetch = 0 : i64, scratch_operands = 0 : i64, tpu.core_type = #tpu.core_type<tc>, window_params = [{transform_indices = @transform_0, window_bounds = array<i64: 1, 64, 32>}, {transform_indices = @transform_1, window_bounds = array<i64: 1, 64, 64>}]} {
    %c0 = arith.constant 0 : index
    %c0_0 = arith.constant 0 : index
    %c0_1 = arith.constant 0 : index
    %0 = vector.load %arg1[%c0, %c0_0, %c0_1] : memref<1x64x32xf32, #tpu.memory_space<vmem>>, vector<1x64x32xf32>
    %1 = vector.shape_cast %0 : vector<1x64x32xf32> to vector<64x32xf32>
    %cst = arith.constant dense<0.000000e+00> : vector<64x64xf32>
    %2 = tpu.matmul %1, %1, %cst {dimension_numbers = #tpu.dot_dimension_numbers<[1], [1], [0], [0], [0, 0, 1, 0], [], []>} : vector<64x32xf32>, vector<64x32xf32>, vector<64x64xf32> -> vector<64x64xf32>
    %c0_2 = arith.constant 0 : index
    %c0_3 = arith.constant 0 : index
    %c0_4 = arith.constant 0 : index
    %3 = vector.load %arg2[%c0_2, %c0_3, %c0_4] : memref<1x64x64xf32, #tpu.memory_space<vmem>>, vector<1x64x64xf32>
    %4 = vector.shape_cast %3 : vector<1x64x64xf32> to vector<64x64xf32>
    %5 = vector.shape_cast %2 : vector<64x64xf32> to vector<1x64x64xf32>
    tpu.vector_store %arg2[%c0_2, %c0_3, %c0_4], %5 {strides = array<i32>} : memref<1x64x64xf32, #tpu.memory_space<vmem>>, vector<1x64x64xf32>,
    return
  }
  func.func @transform_0(%arg0: i32) -> (i32, i32, i32) {
    %c0_i32 = arith.constant 0 : i32
    %c0_i32_0 = arith.constant 0 : i32
    %c0_i32_1 = arith.constant 0 : i32
    return %arg0, %c0_i32, %c0_i32_0 : i32, i32, i32
  }
  func.func @transform_1(%arg0: i32) -> (i32, i32, i32) {
    %c0_i32 = arith.constant 0 : i32
    %c0_i32_0 = arith.constant 0 : i32
    %c0_i32_1 = arith.constant 0 : i32
    return %arg0, %c0_i32, %c0_i32_0 : i32, i32, i32
  }
}

module attributes {stable_mosaic.version = 11 : i64} {
  func.func @_simplex_kernel(%arg0: memref<2x3x64xf32, #tpu.memory_space<vmem>>, %arg1: memref<2x3x1xf32, #tpu.memory_space<vmem>>, %arg2: memref<2x64xf32, #tpu.memory_space<vmem>>) attributes {dimension_semantics = [], scalar_prefetch = 0 : i64, scratch_operands = 0 : i64, tpu.core_type = #tpu.core_type<tc>} {
    %c0 = arith.constant 0 : index
    %c0_0 = arith.constant 0 : index
    %c0_1 = arith.constant 0 : index
    %0 = vector.load %arg0[%c0, %c0_0, %c0_1] : memref<2x3x64xf32, #tpu.memory_space<vmem>>, vector<2x3x64xf32>
    %c0_2 = arith.constant 0 : index
    %c0_3 = arith.constant 0 : index
    %c0_4 = arith.constant 0 : index
    %1 = vector.load %arg1[%c0_2, %c0_3, %c0_4] : memref<2x3x1xf32, #tpu.memory_space<vmem>>, vector<2x3x1xf32>
    %cst = arith.constant dense<0.000000e+00> : vector<2x1xf32>
    %2 = vector.multi_reduction <add>, %1, %cst [1] : vector<2x3x1xf32> to vector<2x1xf32>
    %3 = vector.shape_cast %2 : vector<2x1xf32> to vector<2x1x1xf32>
    %4 = vector.broadcast %3 : vector<2x1x1xf32> to vector<2x3x1xf32>
    %5 = arith.divf %1, %4 : vector<2x3x1xf32>
    %6 = vector.broadcast %5 : vector<2x3x1xf32> to vector<2x3x64xf32>
    %7 = arith.mulf %0, %6 : vector<2x3x64xf32>
    %cst_5 = arith.constant dense<0.000000e+00> : vector<2x64xf32>
    %8 = vector.multi_reduction <add>, %7, %cst_5 [1] : vector<2x3x64xf32> to vector<2x64xf32>
    %c0_6 = arith.constant 0 : index
    %c0_7 = arith.constant 0 : index
    %9 = vector.load %arg2[%c0_6, %c0_7] : memref<2x64xf32, #tpu.memory_space<vmem>>, vector<2x64xf32>
    tpu.vector_store %arg2[%c0_6, %c0_7], %8 {strides = array<i32>} : memref<2x64xf32, #tpu.memory_space<vmem>>, vector<2x64xf32>,
    return
  }
}

</mosaic_0001>

<bundles_post_ra>
// kernel: custom-call.2
= control target key start
LH: loop header
LB: loop body
LE: loop exit
PB: predicated region body
PF: predicated region fallthrough
CT: control target
= control target key end

     0   :  { %s4272_s0 = inlined_call_operand.vmem [shape: f32[2,32,32], index: 0, kind: input, shape index: {}]   ;;  %s4273_s1 = inlined_call_operand.vmem [shape: f32[2,32,32], index: 1, kind: input, shape index: {}]   ;;  %s4274_s2 = inlined_call_operand.vmem [shape: f32[2,32,32], index: 2, kind: input, shape index: {}]   ;;  %s4275_s3 = inlined_call_operand.vmem [shape: f32[2,32,32], index: 3, kind: input, shape index: {}]   ;;  %s4276_s4 = inlined_call_operand.vmem [shape: f32[2,32], index: 4, kind: output, shape index: {0}]   ;;  %s4277_s5 = inlined_call_operand.vmem [shape: f32[2,32], index: 5, kind: output, shape index: {1}]   ;;  %s4278_s6 = inlined_call_operand.vmem [shape: f32[2,32,32], index: 6, kind: output, shape index: {2}]   ;;  %s4279_s7 = inlined_call_operand.vmem [shape: f32[2,32,32], index: 7, kind: output, shape index: {3}]   ;;  %s4280_s8 = inlined_call_operand.vmem [shape: f32[2,32,32], index: 8, kind: output, shape index: {4}]   ;;  %s4281_s9 = inlined_call_operand.vmem [shape: f32[2,32,32], index: 9, kind: output, shape index: {5}]  }
   0x1   :  { %4288 = sst [smem:[#allocation28_spill]] %s4272_s0 }
   0x2   :  { %4289 = sst [smem:[#allocation29_spill]] %s4273_s1 }
   0x3   :  { %4290 = sst [smem:[#allocation30_spill]] %s4274_s2 }
   0x4   :  { %4291 = sst [smem:[#allocation31_spill]] %s4275_s3 }
   0x5   :  { %4292 = sst [smem:[#allocation32_spill]] %s4280_s8 }
   0x6   :  { %4293 = sst [smem:[#allocation33_spill]] %s4281_s9 }
   0x7   :  { %s3253_s30 = smov 0   ;;  %s3255_s10 = smov 0  }
   0x8   :  { %s3257_s11 = smov 0  }
   0x9 LB: > { %4294 = sst [smem:[#allocation25_spill]] %s3186_s10  ;;  %s3269_s12 = sadd.s32 4294967295, %s3190_s11   ;;  %s3190_s11 = sphi %s3257_s11, %s4318_s11   ;;  %s3186_s10 = sphi %s3255_s10, %s4320_s10   ;;  %s3182_s30 = sphi %s3253_s30, %s4319_s30  }
   0xa   : > { %s3272_s13 = sadd.s32 1, %s3190_s11   ;;  %s20_s14 = sshrl.u32 %s3190_s11, 3 }
   0xb   : > { %4295 = sst [smem:[#allocation26_spill]] %s3272_s13  ;;  %s21_s15 = sshrl.u32 %s3272_s13, 3 }
   0xc   : > { %s22_s16 = ssub.s32 %s20_s14, %s21_s15  ;;  %s25_s17 = sadd.s32 1, %s3186_s10 }
   0xd   : > { %p23_p0 = scmp.eq.s32.totalorder %s22_s16, 0  ;;  %p35_p1 = scmp.ne.s32.totalorder %s3186_s10, %s3182_s30 }
   0xe   : > { %p36_p2 = scmp.eq.s32.totalorder %s3269_s12, 1  ;;  %p2742_p4 = scmp.ge.s32.totalorder %s3190_s11, 2 }
   0xf   : > { %s3281_s18 = scalar_select %p23_p0, %s3186_s10, %s25_s17  }
  0x10   : > { %p3283_p3 = por %p36_p2, %p35_p1  ;;  %86 = sbr.rel (%p2742_p4) target bundleno = 35 (0x23), region = 16 }
  0x11   : > { %4296 = sst [smem:[#allocation27_spill]] %s3281_s18  ;;  %s88_s20 = sand.u32 (!%p2742_p4), 1, %s3190_s11  }
  0x12   : > { %s2744_s21 = sshll.u32 (!%p2742_p4), %s3190_s11, 5  ;;  %s3290_s22 = sshll.u32 (!%p2742_p4), %s88_s20, 5 }
  0x13   : > { %s4298_s0 = sld [smem:[#allocation28_spill]] (!%p2742_p4)  ;;  %s90_s26 = scalar_lea.vmem (!%p2742_p4), [#allocation0], %s3290_s22 }
  0x14   : > { %s4299_s1 = sld [smem:[#allocation29_spill]] (!%p2742_p4)  ;;  %s4300_s2 = sld [smem:[#allocation30_spill]] (!%p2742_p4) }
  0x15   : > { %s119_s17 = scalar_lea.vmem (!%p2742_p4), [#allocation1], %s3290_s22  ;;  %s4301_s3 = sld [smem:[#allocation31_spill]] (!%p2742_p4) }
  0x19   : > { %s92_s25 = scalar_lea.vmem %s4298_s0, %s2744_s21 }
  0x1a   : > { %v105_v0 = vld [vmem:[%s92_s25] sm:$0xff]  ;;  %v107_v1 = vld [vmem:[%s92_s25 + $0x8] sm:$0xff]  ;;  %v109_v2 = vld [vmem:[%s92_s25 + $0x10] sm:$0xff]  ;;  %s121_s29 = scalar_lea.vmem %s4299_s1, %s2744_s21  ;;  %s150_s16 = scalar_lea.vmem %s4300_s2, %s2744_s21 }
  0x1b   : > { %106 = vst [vmem:[%s90_s26] sm:$0xff] %v105_v0  ;;  %108 = vst [vmem:[%s90_s26 + $0x8] sm:$0xff] %v107_v1  ;;  %v111_v3 = vld [vmem:[%s92_s25 + $0x18] sm:$0xff]  ;;  %v134_v4 = vld [vmem:[%s121_s29] sm:$0xff]  ;;  %s179_s24 = scalar_lea.vmem %s4301_s3, %s2744_s21  ;;  %s148_s25 = scalar_lea.vmem [#allocation2], %s3290_s22 }
  0x1c   : > { %110 = vst [vmem:[%s90_s26 + $0x10] sm:$0xff] %v109_v2  ;;  %112 = vst [vmem:[%s90_s26 + $0x18] sm:$0xff] %v111_v3  ;;  %v136_v5 = vld [vmem:[%s121_s29 + $0x8] sm:$0xff]  ;;  %v138_v6 = vld [vmem:[%s121_s29 + $0x10] sm:$0xff]  ;;  %s177_s26 = scalar_lea.vmem [#allocation3], %s3290_s22 }
  0x1d   : > { %135 = vst [vmem:[%s119_s17] sm:$0xff] %v134_v4  ;;  %137 = vst [vmem:[%s119_s17 + $0x8] sm:$0xff] %v136_v5  ;;  %v140_v7 = vld [vmem:[%s121_s29 + $0x18] sm:$0xff]  ;;  %v163_v8 = vld [vmem:[%s150_s16] sm:$0xff] }
  0x1e   : > { %139 = vst [vmem:[%s119_s17 + $0x10] sm:$0xff] %v138_v6  ;;  %v165_v9 = vld [vmem:[%s150_s16 + $0x8] sm:$0xff]  ;;  %141 = vst [vmem:[%s119_s17 + $0x18] sm:$0xff] %v140_v7  ;;  %v167_v10 = vld [vmem:[%s150_s16 + $0x10] sm:$0xff] }
  0x1f   : > { %164 = vst [vmem:[%s148_s25] sm:$0xff] %v163_v8  ;;  %166 = vst [vmem:[%s148_s25 + $0x8] sm:$0xff] %v165_v9  ;;  %v169_v11 = vld [vmem:[%s150_s16 + $0x18] sm:$0xff]  ;;  %v192_v12 = vld [vmem:[%s179_s24] sm:$0xff] }
  0x20   : > { %168 = vst [vmem:[%s148_s25 + $0x10] sm:$0xff] %v167_v10  ;;  %170 = vst [vmem:[%s148_s25 + $0x18] sm:$0xff] %v169_v11  ;;  %v194_v13 = vld [vmem:[%s179_s24 + $0x8] sm:$0xff]  ;;  %v196_v14 = vld [vmem:[%s179_s24 + $0x10] sm:$0xff] }
  0x21   : > { %193 = vst [vmem:[%s177_s26] sm:$0xff] %v192_v12  ;;  %v198_v15 = vld [vmem:[%s179_s24 + $0x18] sm:$0xff]  ;;  %195 = vst [vmem:[%s177_s26 + $0x8] sm:$0xff] %v194_v13 }
  0x22   : > { %197 = vst [vmem:[%s177_s26 + $0x10] sm:$0xff] %v196_v14  ;;  %199 = vst [vmem:[%s177_s26 + $0x18] sm:$0xff] %v198_v15 }
  0x23 PF: > { %p2751_p5 = scmp.ge.s32.totalorder %s3190_s11, 1  ;;  %p204_p6 = scmp.lt.s32.totalorder %s3190_s11, 3 }
  0x25   : > { %p205_p7 = pnand %p2751_p5, %p204_p6 }
  0x27   : > { %208 = sbr.rel (%p205_p7) target bundleno = 1200 (0x4b0), region = 96 }
  0x2e   : > { %s211_s21 = sand.u32 1, %s3269_s12   ;;  %s245_s27 = sand.u32 1, %s3182_s30   ;;  %v361_v16 = vlaneseq  ;;  %v3200_v31 = vmov 0.0  }
  0x2f   : > { %s3312_s22 = sshll.u32 %s211_s21, 5  ;;  %s3314_s28 = sshll.u32 %s245_s27, 1 }
  0x30   : > { %v3316_v17 = vshrl.u32 %v361_v16, 7  ;;  %s213_s29 = scalar_lea.vmem [#allocation0], %s3312_s22  ;;  %s217_s11 = scalar_lea.vmem [#allocation1], %s3312_s22  ;;  %v3320_v24 = vand.u32 127, %v361_v16 }
  0x31   : > { %v273_v18 = vld [vmem:[%s213_s29] sm:$0xff]  ;;  %v2762_v19 = vld [vmem:[%s213_s29 + $0x8] sm:$0xff]  ;;  %v2764_v20 = vld [vmem:[%s213_s29 + $0x10] sm:$0xff]  ;;  %s221_s30 = scalar_lea.vmem [#allocation2], %s3312_s22  ;;  %s3330_s14 = scalar_lea.vmem [#allocation8], %s3312_s22 }
  0x32   : > { %v2766_v21 = vld [vmem:[%s213_s29 + $0x18] sm:$0xff]  ;;  %v288_v22 = vld [vmem:[%s217_s11] sm:$0xff]  ;;  %v2768_v23 = vld [vmem:[%s217_s11 + $0x8] sm:$0xff]  ;;  %v3323_v17 = vmov %v3316_v17  ;;  %332 = vst [vmem:[%s3330_s14] sm:$0xff] %v3200_v31  ;;  %s3337_s15 = scalar_lea.vmem [#allocation9], %s3312_s22  ;;  %s272_s16 = smov [#allocation12]  ;;  %v363_v24 = vmov %v3320_v24  ;;  %vm2541_vm8 = vcmp.lt.s32.totalorder %v3320_v24, 32 }
  0x33   : > { %v2770_v25 = vld [vmem:[%s217_s11 + $0x10] sm:$0xff]  ;;  %v2772_v26 = vld [vmem:[%s217_s11 + $0x18] sm:$0xff]  ;;  %v303_v27 = vld [vmem:[%s221_s30] sm:$0xff]  ;;  %v3327_v17 = vmov %v3316_v17  ;;  %2786 = vst [vmem:[%s3330_s14 + $0x8] sm:$0xff] %v3200_v31  ;;  %v376_v32 = vadd.s32 8, %v3323_v17  ;;  %s287_s17 = smov [#allocation13]  ;;  %v397_v24 = vmov %v3320_v24  ;;  %vm370_vm0 = vcmp.eq.s32.totalorder %v3323_v17, %v363_v24 }
  0x34   : > { %v2774_v28 = vld [vmem:[%s221_s30 + $0x8] sm:$0xff]  ;;  %v2776_v29 = vld [vmem:[%s221_s30 + $0x10] sm:$0xff]  ;;  %v2778_v30 = vld [vmem:[%s221_s30 + $0x18] sm:$0xff]  ;;  %2787 = vst [vmem:[%s3330_s14 + $0x10] sm:$0xff] %v3200_v31  ;;  %s225_s20 = scalar_lea.vmem [#allocation3], %s3312_s22  ;;  %s3346_s23 = scalar_lea.vmem [#allocation10], %s3312_s22  ;;  %vm404_vm4 = vcmp.eq.s32.totalorder %v3327_v17, %v397_v24 }
  0x35   : > { %2788 = vst [vmem:[%s3330_s14 + $0x18] sm:$0xff] %v3200_v31  ;;  %339 = vst [vmem:[%s3337_s15] sm:$0xff] %v3200_v31  ;;  %v318_v33 = vld [vmem:[%s225_s20] sm:$0xff]  ;;  %v2780_v34 = vld [vmem:[%s225_s20 + $0x8] sm:$0xff]  ;;  %s3353_s24 = scalar_lea.vmem [#allocation11], %s3312_s22  ;;  %v383_v36 = vadd.s32 16, %v3323_v17  ;;  %s302_s25 = smov [#allocation14]  ;;  %vm377_vm1 = vcmp.eq.s32.totalorder %v376_v32, %v363_v24 }
  0x36   : > { %2789 = vst [vmem:[%s3337_s15 + $0x8] sm:$0xff] %v3200_v31  ;;  %2790 = vst [vmem:[%s3337_s15 + $0x10] sm:$0xff] %v3200_v31  ;;  %v2782_v35 = vld [vmem:[%s225_s20 + $0x10] sm:$0xff]  ;;  %s317_s26 = smov [#allocation15]  ;;  %v2784_v37 = vld [vmem:[%s225_s20 + $0x18] sm:$0xff]  ;;  %v390_v38 = vadd.s32 24, %v3323_v17  ;;  %s360_s14 = smov %s3330_s14 }
  0x37   : > { %2791 = vst [vmem:[%s3337_s15 + $0x18] sm:$0xff] %v3200_v31  ;;  %346 = vst [vmem:[%s3346_s23] sm:$0xff] %v3200_v31  ;;  %v410_v39 = vadd.s32 8, %v3327_v17  ;;  %v417_v40 = vadd.s32 16, %v3327_v17  ;;  %v424_v41 = vadd.s32 24, %v3327_v17  ;;  %vm384_vm2 = vcmp.eq.s32.totalorder %v383_v36, %v363_v24  ;;  %s2537_s22 = smov [#allocation12]  ;;  %s2581_s29 = smov [#allocation13] }
  0x38   : > { %2792 = vst [vmem:[%s3346_s23 + $0x8] sm:$0xff] %v3200_v31  ;;  %2793 = vst [vmem:[%s3346_s23 + $0x10] sm:$0xff] %v3200_v31  ;;  %vm391_vm3 = vcmp.eq.s32.totalorder %v390_v38, %v363_v24  ;;  %v2536_v17 = vmov %v3316_v17  ;;  %s3394_s11 = smov [#allocation14]  ;;  %s2651_s30 = smov [#allocation15] }
  0x39   : > { %2794 = vst [vmem:[%s3346_s23 + $0x18] sm:$0xff] %v3200_v31  ;;  %353 = vst [vmem:[%s3353_s24] sm:$0xff] %v3200_v31  ;;  %vm411_vm5 = vcmp.eq.s32.totalorder %v410_v39, %v397_v24  ;;  %vm418_vm6 = vcmp.eq.s32.totalorder %v417_v40, %v397_v24  ;;  %vm425_vm7 = vcmp.eq.s32.totalorder %v424_v41, %v397_v24  ;;  %v2577_v24 = vmov %v3320_v24 }
  0x3a   : > { %2795 = vst [vmem:[%s3353_s24 + $0x8] sm:$0xff] %v3200_v31  ;;  %2796 = vst [vmem:[%s3353_s24 + $0x10] sm:$0xff] %v3200_v31  ;;  %v2533_v24 = vmov %v3320_v24  ;;  %v2552_v12 = vadd.s32 8, %v2536_v17 }
  0x3b   : > { %2797 = vst [vmem:[%s3353_s24 + $0x18] sm:$0xff] %v3200_v31  ;;  %274 = vst [vmem:[%s272_s16] sm:$0xff] %v273_v18  ;;  %s394_s24 = smov %s3353_s24  ;;  %vm2546_vm9 = vcmp.eq.s32.totalorder %v2536_v17, %v2533_v24  ;;  %v2570_v31 = vadd.s32 24, %v2536_v17 }
  0x3c   : > { %2763 = vst [vmem:[%s272_s16 + $0x8] sm:$0xff] %v2762_v19  ;;  %2765 = vst [vmem:[%s272_s16 + $0x10] sm:$0xff] %v2764_v20  ;;  %v367_v42 = vld [vmem:[%s360_s14] sm:$0xff]  ;;  %v2798_v43 = vld [vmem:[%s360_s14 + $0x8] sm:$0xff]  ;;  %vm2553_vm10 = vcmp.eq.s32.totalorder %v2552_v12, %v2533_v24 }
  0x3d   : > { %2767 = vst [vmem:[%s272_s16 + $0x18] sm:$0xff] %v2766_v21  ;;  %289 = vst [vmem:[%s287_s17] sm:$0xff] %v288_v22  ;;  %v2800_v44 = vld [vmem:[%s360_s14 + $0x10] sm:$0xff]  ;;  %v371_v45 = vsel %vm370_vm0, 1.0, %v367_v42  ;;  %v378_v46 = vsel %vm377_vm1, 1.0, %v2798_v43  ;;  %v2802_v48 = vld [vmem:[%s360_s14 + $0x18] sm:$0xff]  ;;  %vm2571_vm12 = vcmp.eq.s32.totalorder %v2570_v31, %v2533_v24 }
  0x3e   : > { %2769 = vst [vmem:[%s287_s17 + $0x8] sm:$0xff] %v2768_v23  ;;  %2771 = vst [vmem:[%s287_s17 + $0x10] sm:$0xff] %v2770_v25  ;;  %v385_v47 = vsel %vm384_vm2, 1.0, %v2800_v44  ;;  %v392_v51 = vsel %vm391_vm3, 1.0, %v2802_v48 }
  0x3f   : > { %2773 = vst [vmem:[%s287_s17 + $0x18] sm:$0xff] %v2772_v26  ;;  %304 = vst [vmem:[%s302_s25] sm:$0xff] %v303_v27 }
  0x40   : > { %2775 = vst [vmem:[%s302_s25 + $0x8] sm:$0xff] %v2774_v28  ;;  %2777 = vst [vmem:[%s302_s25 + $0x10] sm:$0xff] %v2776_v29 }
  0x41   : > { %2779 = vst [vmem:[%s302_s25 + $0x18] sm:$0xff] %v2778_v30  ;;  %319 = vst [vmem:[%s317_s26] sm:$0xff] %v318_v33  ;;  %v2561_v30 = vadd.s32 16, %v2536_v17  ;;  %v2580_v17 = vmov %v3316_v17 }
  0x42   : > { %2781 = vst [vmem:[%s317_s26 + $0x8] sm:$0xff] %v2780_v34  ;;  %2783 = vst [vmem:[%s317_s26 + $0x10] sm:$0xff] %v2782_v35  ;;  %v401_v49 = vld [vmem:[%s394_s24] sm:$0xff]  ;;  %v2804_v50 = vld [vmem:[%s394_s24 + $0x8] sm:$0xff]  ;;  %v2615_v17 = vmov %v3316_v17 }
  0x43   : > { %2785 = vst [vmem:[%s317_s26 + $0x18] sm:$0xff] %v2784_v37  ;;  %372 = vst [vmem:[%s360_s14] sm:$0xff] %v371_v45  ;;  %v405_v52 = vsel %vm404_vm4, 1.0, %v401_v49  ;;  %v412_v53 = vsel %vm411_vm5, 1.0, %v2804_v50  ;;  %v2806_v54 = vld [vmem:[%s394_s24 + $0x10] sm:$0xff]  ;;  %v2808_v55 = vld [vmem:[%s394_s24 + $0x18] sm:$0xff]  ;;  %vm2562_vm11 = vcmp.eq.s32.totalorder %v2561_v30, %v2533_v24  ;;  %v2612_v24 = vmov %v3320_v24 }
  0x44   : > { %2799 = vst [vmem:[%s360_s14 + $0x8] sm:$0xff] %v378_v46  ;;  %2801 = vst [vmem:[%s360_s14 + $0x10] sm:$0xff] %v385_v47  ;;  %v419_v56 = vsel %vm418_vm6, 1.0, %v2806_v54  ;;  %v426_v57 = vsel %vm425_vm7, 1.0, %v2808_v55  ;;  %v2543_v58 = vld [vmem:[%s2537_s22] sm:$0xff]  ;;  %v2810_v59 = vld [vmem:[%s2537_s22 + $0x8] sm:$0xff]  ;;  %v2650_v17 = vmov %v3316_v17  ;;  %v2647_v24 = vmov %v3320_v24 }
  0x45   : > { %2803 = vst [vmem:[%s360_s14 + $0x18] sm:$0xff] %v392_v51  ;;  %406 = vst [vmem:[%s394_s24] sm:$0xff] %v405_v52  ;;  %v2811_v60 = vld [vmem:[%s2537_s22 + $0x10] sm:$0xff]  ;;  %v2544_v61 = vsel %vm2541_vm8, %v2543_v58, 0.0  ;;  %v2550_v62 = vsel %vm2541_vm8, %v2810_v59, 0.0  ;;  %v2812_v0 = vld [vmem:[%s2537_s22 + $0x18] sm:$0xff]  ;;  %vm2660_vm13 = vcmp.eq.s32.totalorder %v2650_v17, %v2647_v24 }
  0x46   : > { %2805 = vst [vmem:[%s394_s24 + $0x8] sm:$0xff] %v412_v53  ;;  %2807 = vst [vmem:[%s394_s24 + $0x10] sm:$0xff] %v419_v56  ;;  %v2559_v63 = vsel %vm2541_vm8, %v2811_v60, 0.0  ;;  %v2587_v1 = vld [vmem:[%s2581_s29] sm:$0xff]  ;;  %v2545_v2 = vmul.f32 %v2544_v61, %v2544_v61  ;;  %v2551_v3 = vmul.f32 %v2550_v62, %v2550_v62  ;;  %v2568_v5 = vsel %vm2541_vm8, %v2812_v0, 0.0  ;;  %v2813_v6 = vld [vmem:[%s2581_s29 + $0x8] sm:$0xff] }
  0x47   : > { %2809 = vst [vmem:[%s394_s24 + $0x18] sm:$0xff] %v426_v57  ;;  %v2560_v4 = vmul.f32 %v2559_v63, %v2559_v63  ;;  %v2588_v7 = vsel %vm2541_vm8, %v2587_v1, 0.0  ;;  %v2569_v9 = vmul.f32 %v2568_v5, %v2568_v5  ;;  %v2814_v10 = vld [vmem:[%s2581_s29 + $0x10] sm:$0xff]  ;;  %v2594_v11 = vsel %vm2541_vm8, %v2813_v6, 0.0  ;;  %v2815_v15 = vld [vmem:[%s2581_s29 + $0x18] sm:$0xff] }
  0x48   : > { %v2556_v8 = vadd.f32 %v2551_v3, %v2545_v2  ;;  %v2589_v14 = vmul.f32 %v2588_v7, %v2588_v7  ;;  %v2600_v16 = vsel %vm2541_vm8, %v2814_v10, 0.0  ;;  %v2595_v19 = vmul.f32 %v2594_v11, %v2594_v11  ;;  %v2622_v20 = vld [vmem:[%s3394_s11] sm:$0xff]  ;;  %v2816_v22 = vld [vmem:[%s3394_s11 + $0x8] sm:$0xff]  ;;  %v2817_v35 = vld [vmem:[%s3394_s11 + $0x10] sm:$0xff] }
  0x49   : > { %v2606_v21 = vsel %vm2541_vm8, %v2815_v15, 0.0  ;;  %v2547_v23 = vsel %vm2546_vm9, 0.0, %v2545_v2  ;;  %v2601_v26 = vmul.f32 %v2600_v16, %v2600_v16  ;;  %v2554_v27 = vsel %vm2553_vm10, 0.0, %v2551_v3  ;;  %v2818_v38 = vld [vmem:[%s3394_s11 + $0x18] sm:$0xff] }
  0x4a   : > { %v2565_v13 = vadd.f32 %v2560_v4, %v2556_v8  ;;  %v2623_v28 = vsel %vm2541_vm8, %v2622_v20, 0.0  ;;  %v2555_v29 = vadd.f32 %v2554_v27, %v2547_v23  ;;  %v2607_v33 = vmul.f32 %v2606_v21, %v2606_v21  ;;  %v2657_v45 = vld [vmem:[%s2651_s30] sm:$0xff]  ;;  %v2819_v50 = vld [vmem:[%s2651_s30 + $0x8] sm:$0xff]  ;;  %v2820_v55 = vld [vmem:[%s2651_s30 + $0x10] sm:$0xff] }
  0x4b   : > { %v2629_v34 = vsel %vm2541_vm8, %v2816_v22, 0.0  ;;  %v2624_v37 = vmul.f32 %v2623_v28, %v2623_v28  ;;  %v2563_v39 = vsel %vm2562_vm11, 0.0, %v2560_v4  ;;  %v2572_v40 = vsel %vm2571_vm12, 0.0, %v2569_v9  ;;  %v2821_v60 = vld [vmem:[%s2651_s30 + $0x18] sm:$0xff] }
  0x4c   : > { %v2574_v18 = vadd.f32 %v2569_v9, %v2565_v13  ;;  %v2635_v41 = vsel %vm2541_vm8, %v2817_v35, 0.0  ;;  %v2564_v42 = vadd.f32 %v2563_v39, %v2555_v29  ;;  %v2630_v44 = vmul.f32 %v2629_v34, %v2629_v34 }
  0x4d   : > { %v2641_v46 = vsel %vm2541_vm8, %v2818_v38, 0.0  ;;  %v2636_v49 = vmul.f32 %v2635_v41, %v2635_v41  ;;  %v2658_v51 = vsel %vm2541_vm8, %v2657_v45, 0.0  ;;  %v2666_v56 = vsel %vm2541_vm8, %v2819_v50, 0.0 }
  0x4e   : > { %v2591_v25 = vadd.f32 %v2589_v14, %v2574_v18  ;;  %v2573_v47 = vadd.f32 %v2572_v40, %v2564_v42  ;;  %v2642_v54 = vmul.f32 %v2641_v46, %v2641_v46  ;;  %v2659_v59 = vmul.f32 %v2658_v51, %v2658_v51 }
  0x4f   : > { %v2675_v61 = vsel %vm2541_vm8, %v2820_v55, 0.0  ;;  %v2667_v0 = vmul.f32 %v2666_v56, %v2666_v56  ;;  %v2684_v1 = vsel %vm2541_vm8, %v2821_v60, 0.0  ;;  %v2668_v6 = vadd.s32 8, %v2650_v17 }
  0x50   : > { %v2597_v32 = vadd.f32 %v2595_v19, %v2591_v25  ;;  %v2590_v52 = vadd.f32 %v2589_v14, %v2573_v47  ;;  %v2676_v4 = vmul.f32 %v2675_v61, %v2675_v61  ;;  %v2685_v8 = vmul.f32 %v2684_v1, %v2684_v1 }
  0x51   : > { %v2677_v10 = vadd.s32 16, %v2650_v17  ;;  %vm2669_vm14 = vcmp.eq.s32.totalorder %v2668_v6, %v2647_v24  ;;  %v2686_v13 = vadd.s32 24, %v2650_v17  ;;  %v2661_v15 = vsel %vm2660_vm13, 0.0, %v2659_v59 }
  0x52   : > { %v2603_v36 = vadd.f32 %v2601_v26, %v2597_v32  ;;  %v2596_v57 = vadd.f32 %v2595_v19, %v2590_v52  ;;  %v2670_v18 = vsel %vm2669_vm14, 0.0, %v2667_v0 }
  0x53   : > { %vm2678_vm15 = vcmp.eq.s32.totalorder %v2677_v10, %v2647_v24  ;;  %vm2687_vm0 = vcmp.eq.s32.totalorder %v2686_v13, %v2647_v24 }
  0x54   : > { %v2609_v43 = vadd.f32 %v2607_v33, %v2603_v36  ;;  %v2602_v62 = vadd.f32 %v2601_v26, %v2596_v57  ;;  %v2679_v20 = vsel %vm2678_vm15, 0.0, %v2676_v4  ;;  %v2688_v22 = vsel %vm2687_vm0, 0.0, %v2685_v8 }
  0x56   : > { %v2626_v48 = vadd.f32 %v2624_v37, %v2609_v43  ;;  %v2608_v2 = vadd.f32 %v2607_v33, %v2602_v62 }
  0x58   : > { %v2632_v53 = vadd.f32 %v2630_v44, %v2626_v48  ;;  %v2625_v5 = vadd.f32 %v2624_v37, %v2608_v2 }
  0x5a   : > { %v2638_v58 = vadd.f32 %v2636_v49, %v2632_v53  ;;  %v2631_v9 = vadd.f32 %v2630_v44, %v2625_v5 }
  0x5c   : > { %v2644_v63 = vadd.f32 %v2642_v54, %v2638_v58  ;;  %v2637_v12 = vadd.f32 %v2636_v49, %v2631_v9 }
  0x5e   : > { %v2663_v3 = vadd.f32 %v2659_v59, %v2644_v63  ;;  %v2643_v16 = vadd.f32 %v2642_v54, %v2637_v12 }
  0x60   : > { %v2672_v7 = vadd.f32 %v2667_v0, %v2663_v3  ;;  %v2662_v19 = vadd.f32 %v2661_v15, %v2643_v16 }
  0x62   : > { %v2681_v11 = vadd.f32 %v2676_v4, %v2672_v7  ;;  %v2671_v21 = vadd.f32 %v2670_v18, %v2662_v19 }
  0x64   : > { %v2690_v14 = vadd.f32 %v2685_v8, %v2681_v11  ;;  %v2680_v23 = vadd.f32 %v2679_v20, %v2671_v21 }
  0x66   : > { %2691 = vadd.xlane.f32.xlu0 %v2690_v14  ;;  %v2689_v25 = vadd.f32 %v2688_v22, %v2680_v23 }
  0x6a   : > { %2699 = vadd.xlane.f32.xlu0 %v2689_v25 }
  0xf3   : > { %v2692_v26 = vpop.xlane.xlu0 %2691 }
  0xf4   : > { %v2693_v27 = vrot.slane %v2692_v26, 4 }
  0xf6   : > { %v2694_v28 = vadd.f32 %v2693_v27, %v2692_v26 }
  0xf7   : > { %v2700_v30 = vpop.xlane.xlu0 %2699 }
  0xf8   : > { %v2695_v29 = vrot.slane %v2694_v28, 2  ;;  %v2701_v31 = vrot.slane %v2700_v30, 4 }
  0xfa   : > { %v2702_v32 = vadd.f32 %v2701_v31, %v2700_v30  ;;  %v2696_v33 = vadd.f32 %v2695_v29, %v2694_v28 }
  0xfc   : > { %v2703_v34 = vrot.slane %v2702_v32, 2  ;;  %v2697_v36 = vrot.slane %v2696_v33, 1 }
  0xfe   : > { %v2704_v35 = vadd.f32 %v2703_v34, %v2702_v32  ;;  %v2698_v39 = vadd.f32 %v2697_v36, %v2696_v33 }
 0x100   : > { %v2705_v37 = vrot.slane %v2704_v35, 1 }
 0x102   : > { %v2706_v38 = vadd.f32 %v2705_v37, %v2704_v35 }
 0x104   : > { %3101 = vpush %v2706_v38 }
 0x105   : > { %3103 = vpush %v2698_v39 }
 0x135   : > { %s3102_s16 = spop %3101 }
 0x136   : > { %s3104_s17 = spop %3103 }
 0x137   : > { %s2709_s20 = smul.f32 1e-10, %s3104_s17 }
 0x139   : > { %p2710_p8 = scmp.le.f32.partialorder %s3102_s16, %s2709_s20 }
 0x13a   : > { %s3425_s25 = smov (!%p2710_p8), 0  }
 0x13b   : > { %2713 = sbr.rel (%p2710_p8) target bundleno = 1145 (0x479), region = 586 }
 0x142 LB: >> { %s3430_s26 = smov 0   ;;  %s3194_s25 = sphi %s3425_s25, %s4311_s25  }
 0x143 LB: >>> { %s628_s22 = smov [#allocation12]  ;;  %v632_v24 = vmov %v3320_v24  ;;  %v635_v17 = vmov %v3316_v17  ;;  %s666_s29 = smov [#allocation13]  ;;  %s3198_s26 = sphi %s3430_s26, %s627_s26  }
 0x144   : >>> { %v670_v24 = vmov %v3320_v24  ;;  %v673_v17 = vmov %v3316_v17  ;;  %v636_v40 = vld [vmem:[%s628_s22] sm:$0xff]  ;;  %vm639_vm1 = vcmp.eq.s32.totalorder %v635_v17, %v632_v24  ;;  %v2822_v41 = vld [vmem:[%s628_s22 + $0x8] sm:$0xff]  ;;  %v644_v42 = vadd.s32 8, %v635_v17  ;;  %v2823_v46 = vld [vmem:[%s628_s22 + $0x10] sm:$0xff]  ;;  %s704_s11 = smov [#allocation15]  ;;  %s629_s30 = smov [#allocation16] }
 0x145   : >>> { %v650_v43 = vadd.s32 16, %v635_v17  ;;  %v656_v44 = vadd.s32 24, %v635_v17  ;;  %v640_v45 = vsel %vm639_vm1, %v636_v40, 0.0  ;;  %v2824_v47 = vld [vmem:[%s628_s22 + $0x18] sm:$0xff]  ;;  %vm677_vm2 = vcmp.eq.s32.totalorder %v673_v17, %v670_v24  ;;  %v674_v50 = vld [vmem:[%s666_s29] sm:$0xff]  ;;  %v2825_v51 = vld [vmem:[%s666_s29 + $0x8] sm:$0xff]  ;;  %s3469_s14 = smov %s3330_s14  ;;  %s3472_s15 = smov %s3337_s15 }
 0x146   : >>> { %v682_v48 = vadd.s32 8, %v673_v17  ;;  %v688_v49 = vadd.s32 16, %v673_v17  ;;  %vm645_vm3 = vcmp.eq.s32.totalorder %v644_v42, %v632_v24  ;;  %v2826_v52 = vld [vmem:[%s666_s29 + $0x10] sm:$0xff]  ;;  %v694_v53 = vadd.s32 24, %v673_v17  ;;  %v2827_v56 = vld [vmem:[%s666_s29 + $0x18] sm:$0xff]  ;;  %v712_v59 = vld [vmem:[%s704_s11] sm:$0xff]  ;;  %s3478_s23 = smov %s3346_s23  ;;  %s3481_s24 = smov %s3353_s24 }
 0x147   : >>> { %vm651_vm4 = vcmp.eq.s32.totalorder %v650_v43, %v632_v24  ;;  %vm657_vm5 = vcmp.eq.s32.totalorder %v656_v44, %v632_v24  ;;  %v646_v54 = vsel %vm645_vm3, %v2822_v41, %v640_v45  ;;  %v678_v55 = vsel %vm677_vm2, %v674_v50, 0.0  ;;  %v2828_v0 = vld [vmem:[%s704_s11 + $0x8] sm:$0xff]  ;;  %v2829_v4 = vld [vmem:[%s704_s11 + $0x10] sm:$0xff]  ;;  %v2830_v8 = vld [vmem:[%s704_s11 + $0x18] sm:$0xff]  ;;  %s667_s16 = smov [#allocation17]  ;;  %s705_s17 = smov [#allocation18] }
 0x148   : >>> { %vm683_vm6 = vcmp.eq.s32.totalorder %v682_v48, %v670_v24  ;;  %vm689_vm7 = vcmp.eq.s32.totalorder %v688_v49, %v670_v24  ;;  %v652_v57 = vsel %vm651_vm4, %v2823_v46, %v646_v54  ;;  %vm695_vm9 = vcmp.eq.s32.totalorder %v694_v53, %v670_v24  ;;  %s746_s20 = smov [#allocation17]  ;;  %s744_s22 = smov [#allocation16] }
 0x149   : >>> { %v684_v58 = vsel %vm683_vm6, %v2825_v51, %v678_v55  ;;  %v708_v24 = vmov %v3320_v24  ;;  %v658_v60 = vsel %vm657_vm5, %v2824_v47, %v652_v57  ;;  %v711_v17 = vmov %v3316_v17  ;;  %s748_s29 = smov [#allocation18]  ;;  %s783_s11 = smov [#allocation19] }
 0x14a   : >>> { %v690_v61 = vsel %vm689_vm7, %v2826_v52, %v684_v58  ;;  %v659_v62 = vrot.slane %v658_v60, 4  ;;  %vm715_vm10 = vcmp.eq.s32.totalorder %v711_v17, %v708_v24  ;;  %v720_v1 = vadd.s32 8, %v711_v17  ;;  %s851_s27 = smov [#allocation23]  ;;  %s3913_s21 = smov [#allocation14] }
 0x14b   : >>> { %v696_v63 = vsel %vm695_vm9, %v2827_v56, %v690_v61  ;;  %v716_v3 = vsel %vm715_vm10, %v712_v59, 0.0  ;;  %v726_v5 = vadd.s32 16, %v711_v17  ;;  %v732_v6 = vadd.s32 24, %v711_v17  ;;  %s3924_s0 = smov [#allocation13]  ;;  %s4302_s1 = smov 127  }
 0x14c   : >>> { %v697_v2 = vrot.slane %v696_v63, 4  ;;  %v660_v7 = vadd.f32 %v659_v62, %v658_v60  ;;  %vm721_vm11 = vcmp.eq.s32.totalorder %v720_v1, %v708_v24  ;;  %v813_v17 = vmov %v3316_v17  ;;  %s3931_s2 = smov [#allocation12]  ;;  %s3934_s3 = smov [#allocation14] }
 0x14d   : >>> { %v722_v10 = vsel %vm721_vm11, %v2828_v0, %v716_v3  ;;  %vm727_vm12 = vcmp.eq.s32.totalorder %v726_v5, %v708_v24  ;;  %vm733_vm13 = vcmp.eq.s32.totalorder %v732_v6, %v708_v24  ;;  %v829_v17 = vmov %v3316_v17  ;;  %s3944_s18 = smov [#allocation15]  ;;  %s3948_s10 = smov [#allocation13] }
 0x14e   : >>> { %v698_v9 = vadd.f32 %v697_v2, %v696_v63  ;;  %v661_v11 = vrot.slane %v660_v7, 2  ;;  %v728_v12 = vsel %vm727_vm12, %v2829_v4, %v722_v10  ;;  %v876_v17 = vmov %v3316_v17  ;;  %s3954_s13 = smov [#allocation15]  ;;  %s3960_s9 = smov [#allocation14] }
 0x14f   : >>> { %v734_v14 = vsel %vm733_vm13, %v2830_v8, %v728_v12  ;;  %v814_v60 = vadd.s32 8, %v813_v17  ;;  %v810_v24 = vmov %v3320_v24  ;;  %v798_v17 = vmov %v3316_v17  ;;  %s3963_s8 = smov [#allocation15]  ;;  %s627_s26 = sadd.s32 1, %s3198_s26  }
 0x150   : >>> { %v699_v13 = vrot.slane %v698_v9, 2  ;;  %v662_v15 = vadd.f32 %v661_v11, %v660_v7  ;;  %v735_v16 = vrot.slane %v734_v14, 4  ;;  %v795_v24 = vmov %v3320_v24  ;;  %p624_p9 = scmp.ge.s32.totalorder %s627_s26, 63  }
 0x151   : >>> { %v830_v61 = vadd.s32 16, %v829_v17  ;;  %v826_v24 = vmov %v3320_v24  ;;  %v877_v62 = vadd.s32 8, %v876_v17  ;;  %v892_v17 = vmov %v3316_v17 }
 0x152   : >>> { %v700_v18 = vadd.f32 %v699_v13, %v698_v9  ;;  %v663_v19 = vrot.slane %v662_v15, 1  ;;  %v736_v20 = vadd.f32 %v735_v16, %v734_v14  ;;  %v873_v24 = vmov %v3320_v24 }
 0x153   : >>> { %vm815_vm2 = vcmp.eq.s32.totalorder %v814_v60, %v810_v24  ;;  %vm800_vm3 = vcmp.eq.s32.totalorder %v798_v17, %v795_v24  ;;  %vm831_vm4 = vcmp.eq.s32.totalorder %v830_v61, %v826_v24  ;;  %v889_v24 = vmov %v3320_v24 }
 0x154   : >>> { %v701_v21 = vrot.slane %v700_v18, 1  ;;  %v664_v22 = vadd.f32 %v663_v19, %v662_v15  ;;  %v737_v23 = vrot.slane %v736_v20, 2  ;;  %vm878_vm5 = vcmp.eq.s32.totalorder %v877_v62, %v873_v24 }
 0x155   : >>> { %v893_v1 = vadd.s32 16, %v892_v17  ;;  %v858_v24 = vmov %v3320_v24  ;;  %v861_v17 = vmov %v3316_v17  ;;  %vm1581_vm11 = vcmp.eq.s32.totalorder %v3316_v17, 0 }
 0x156   : >>> { %v702_v25 = vadd.f32 %v701_v21, %v700_v18  ;;  %665 = vst [vmem:[%s629_s30] sm:$0x1] %v664_v22  ;;  %v738_v26 = vadd.f32 %v737_v23, %v736_v20  ;;  %s785_s30 = smov [#allocation20]  ;;  %v908_v17 = vmov %v3316_v17  ;;  %vm863_vm7 = vcmp.eq.s32.totalorder %v861_v17, %v858_v24 }
 0x157   : >>> { %v845_v17 = vmov %v3316_v17  ;;  %vm894_vm6 = vcmp.eq.s32.totalorder %v893_v1, %v889_v24  ;;  %v909_v10 = vadd.s32 24, %v908_v17  ;;  %v905_v24 = vmov %v3320_v24 }
 0x158   : >>> { %703 = vst [vmem:[%s667_s16] sm:$0x1] %v702_v25  ;;  %v739_v27 = vrot.slane %v738_v26, 1  ;;  %s742_s16 = smov [#allocation21]  ;;  %v846_v11 = vadd.s32 24, %v845_v17  ;;  %v842_v24 = vmov %v3320_v24  ;;  %vm4282_vm12 = vcmp.eq.s32.totalorder %v3316_v17, 7 }
 0x159   : >>> { %s787_s16 = smov %s742_s16  ;;  %vm910_vm9 = vcmp.eq.s32.totalorder %v909_v10, %v905_v24  ;;  %v3762_v17 = vmov %v3316_v17 }
 0x15a   : >>> { %v740_v28 = vadd.f32 %v739_v27, %v738_v26  ;;  %vm847_vm10 = vcmp.eq.s32.totalorder %v846_v11, %v842_v24  ;;  %v1166_v17 = vmov %v3316_v17  ;;  %v1201_v24 = vmov %v3320_v24 }
 0x15b   : >>> { %vm1208_vm13 = vcmp.eq.s32.totalorder %v3762_v17, %v1201_v24  ;;  %v1163_v24 = vmov %v3320_v24 }
 0x15c   : >>> { %741 = vst [vmem:[%s705_s17] sm:$0x1] %v740_v28  ;;  %s743_s17 = smov [#allocation22]  ;;  %v3786_v24 = vmov %v3320_v24 }
 0x15d   : >>> { %v745_v31 = vld [vmem:[%s744_s22] sm:$0xff]  ;;  %s789_s17 = smov %s743_s17  ;;  %s791_s22 = smov [#allocation21] }
 0x15e   : >>> { %v768_v44 = vand.u32 2147483647, %v745_v31 }
 0x15f   : >>> { %v747_v29 = vld [vmem:[%s746_s20] sm:$0xff]  ;;  %s806_s20 = smov [#allocation21] }
 0x160   : >>> { %v751_v30 = vmul.f32 2.0, %v747_v29  ;;  %v769_v49 = vand.u32 2147483647, %v747_v29 }
 0x162   : >>> { %3152 = vrcp.f32 %v751_v30 }
 0x163   : >>> { %v749_v32 = vld [vmem:[%s748_s29] sm:$0xff]  ;;  %s822_s29 = smov [#allocation21] }
 0x164   : >>> { %v750_v33 = vsub.f32 %v749_v32, %v745_v31  ;;  %v770_v45 = vand.u32 2147483647, %v749_v32 }
 0x166   : >>> { %v771_v48 = vmin.f32 %v768_v44, %v770_v45 }
 0x168   : >>> { %v772_v50 = vmul.f32 1.1920929e-08, %v771_v48 }
 0x16a   : >>> { %vm773_vm1 = vcmp.le.f32.partialorder %v769_v49, %v772_v50 }
 0x16c   : >>> { %v3153_v34 = vpop.eup %3152 }
 0x16d   : >>> { %v753_v35 = vmul.f32 %v3153_v34, %v750_v33  ;;  %v1750_v33 = vld [vmem:[%s3472_s15] sm:$0xff] }
 0x16f   : >>> { %v755_v36 = vmul.f32 %v753_v35, %v753_v35  ;;  %vm754_vm0 = vcmp.ge.f32.partialorder %v753_v35, 0.0 }
 0x171   : >>> { %v756_v37 = vadd.f32 1.0, %v755_v36  ;;  %v1752_v36 = vld [vmem:[%s3481_s24] sm:$0xff] }
 0x173   : >>> { %3154 = vrsqrt.f32 %v756_v37  ;;  %vm759_vm14 = vcmp.eq.f32.partialorder %v756_v37, inf  ;;  %v762_v39 = vand.u32 2147483648, %v756_v37  ;;  %vm761_vm15 = vcmp.eq.f32.partialorder %v756_v37, 0.0 }
 0x17d   : >>> { %v3155_v38 = vpop.eup %3154 }
 0x17e   : >>> { %v758_v40 = vmul.f32 %v3155_v38, %v756_v37 }
 0x180   : >>> { %v760_v41 = vsel %vm759_vm14, %v756_v37, %v758_v40 }
 0x181   : >>> { %v763_v42 = vsel %vm761_vm15, %v762_v39, %v760_v41 }
 0x182   : >>> { %v764_v43 = vxor.u32 2147483648, %v763_v42 }
 0x184   : >>> { %v765_v46 = vsel %vm754_vm0, %v763_v42, %v764_v43 }
 0x185   : >>> { %v766_v47 = vadd.f32 %v765_v46, %v753_v35  ;;  %v1751_v35 = vld [vmem:[%s3478_s23] sm:$0xff] }
 0x187   : >>> { %3156 = vrcp.f32 %v766_v47 }
 0x191   : >>> { %v3157_v51 = vpop.eup %3156 }
 0x192   : >>> { %v774_v52 = vsel %vm773_vm1, 0.0, %v3157_v51  ;;  %vm1171_vm1 = vcmp.eq.s32.totalorder %v1166_v17, %v1163_v24 }
 0x193   : >>> { %v775_v53 = vmul.f32 %v774_v52, %v774_v52  ;;  %v779_v54 = vmul.f32 %v774_v52, %v747_v29 }
 0x195   : >>> { %v776_v55 = vadd.f32 1.0, %v775_v53  ;;  %v780_v56 = vsub.f32 %v745_v31, %v779_v54  ;;  %v782_v57 = vadd.f32 %v779_v54, %v749_v32  ;;  %v1749_v32 = vld [vmem:[%s3469_s14] sm:$0xff] }
 0x197   : >>> { %3158 = vrsqrt.f32 %v776_v55  ;;  %784 = vst [vmem:[%s783_s11] sm:$0xff] %v780_v56  ;;  %786 = vst [vmem:[%s785_s30] sm:$0xff] %v782_v57  ;;  %s869_s11 = smov [#allocation22]  ;;  %s885_s30 = smov [#allocation22] }
 0x1a1   : >>> { %v3159_v58 = vpop.eup %3158 }
 0x1a2   : >>> { %788 = vst [vmem:[%s787_s16] sm:$0xff] %v3159_v58  ;;  %v778_v59 = vmul.f32 %v3159_v58, %v774_v52  ;;  %s854_s16 = smov [#allocation22] }
 0x1a4   : >>> { %790 = vst [vmem:[%s789_s17] sm:$0xff] %v778_v59  ;;  %s901_s17 = smov [#allocation22] }
 0x1a9   : >>> { %v807_v63 = vld [vmem:[%s806_s20] ss:$0 sm:$0xff]  ;;  %s838_s20 = smov [#allocation21] }
 0x1aa   : >>> { %v792_v0 = vld [vmem:[%s791_s22] ss:$0 sm:$0xff]  ;;  %v816_v2 = vsel %vm815_vm2, %v807_v63, 0.0  ;;  %s804_s22 = smov [#allocation23] }
 0x1ab   : >>> { %v801_v3 = vsel %vm800_vm3, %v792_v0, 0.0  ;;  %v823_v4 = vld [vmem:[%s822_s29] ss:$0 sm:$0xff]  ;;  %817 = vadd.xlane.f32.xlu1 %v816_v2  ;;  %s819_s29 = smov [#allocation23] }
 0x1ac   : >>> { %802 = vadd.xlane.f32.xlu0 %v801_v3  ;;  %v870_v5 = vld [vmem:[%s869_s11] ss:$0 sm:$0xff]  ;;  %v832_v6 = vsel %vm831_vm4, %v823_v4, 0.0  ;;  %s835_s11 = smov [#allocation23] }
 0x1ad   : >>> { %v879_v7 = vsel %vm878_vm5, %v870_v5, 0.0  ;;  %v886_v8 = vld [vmem:[%s885_s30] ss:$0 sm:$0xff]  ;;  %s867_s30 = smov [#allocation24] }
 0x1ae   : >>> { %v855_v9 = vld [vmem:[%s854_s16] ss:$0 sm:$0xff]  ;;  %v895_v12 = vsel %vm894_vm6, %v886_v8, 0.0  ;;  %s882_s16 = smov [#allocation24] }
 0x1af   : >>> { %880 = vadd.xlane.f32.xlu1 %v879_v7  ;;  %v864_v13 = vsel %vm863_vm7, %v855_v9, 0.0  ;;  %v902_v14 = vld [vmem:[%s901_s17] ss:$0 sm:$0xff]  ;;  %s898_s17 = smov [#allocation24] }
 0x1b0   : >>> { %833 = vadd.xlane.f32.xlu0 %v832_v6  ;;  %v839_v15 = vld [vmem:[%s838_s20] ss:$0 sm:$0xff]  ;;  %v911_v16 = vsel %vm910_vm9, %v902_v14, 0.0  ;;  %s914_s20 = smov [#allocation24] }
 0x1b1   : >>> { %v848_v18 = vsel %vm847_vm10, %v839_v15, 0.0 }
 0x1b3   : >>> { %896 = vadd.xlane.f32.xlu1 %v895_v12 }
 0x1b4   : >>> { %865 = vadd.xlane.f32.xlu0 %v864_v13 }
 0x1b7   : >>> { %912 = vadd.xlane.f32.xlu1 %v911_v16 }
 0x1b8   : >>> { %849 = vadd.xlane.f32.xlu0 %v848_v18 }
 0x238   : >>> { %v818_v19 = vpop.xlane.xlu1 %817 }
 0x239   : >>> { %v803_v20 = vpop.xlane.xlu0 %802 }
 0x23a   : >>> { %805 = vst [vmem:[%s804_s22] sm:$0xff] %v803_v20  ;;  %s3459_s22 = smov [#allocation12] }
 0x23b   : >>> { %2831 = vst [vmem:[%s819_s29 + $0x8] sm:$0xff] %v818_v19  ;;  %s3461_s29 = smov [#allocation13]  ;;  %v925_v28 = vld [vmem:[%s3459_s22] sm:$0xff] }
 0x23c   : >>> { %v881_v22 = vpop.xlane.xlu1 %880  ;;  %v926_v29 = vld [vmem:[%s3461_s29] sm:$0xff] }
 0x23d   : >>> { %v834_v21 = vpop.xlane.xlu0 %833 }
 0x23e   : >>> { %2832 = vst [vmem:[%s835_s11 + $0x10] sm:$0xff] %v834_v21  ;;  %s3463_s11 = smov [#allocation14] }
 0x23f   : >>> { %v927_v30 = vld [vmem:[%s3463_s11] sm:$0xff] }
 0x240   : >>> { %v897_v23 = vpop.xlane.xlu1 %896 }
 0x241   : >>> { %v866_v25 = vpop.xlane.xlu0 %865 }
 0x242   : >>> { %868 = vst [vmem:[%s867_s30] sm:$0xff] %v866_v25  ;;  %s3465_s30 = smov [#allocation15] }
 0x243   : >>> { %2834 = vst [vmem:[%s882_s16 + $0x8] sm:$0xff] %v881_v22  ;;  %s919_s16 = smov [#allocation24]  ;;  %v928_v31 = vld [vmem:[%s3465_s30] sm:$0xff] }
 0x244   : >>> { %2835 = vst [vmem:[%s898_s17 + $0x10] sm:$0xff] %v897_v23  ;;  %v913_v26 = vpop.xlane.xlu1 %912  ;;  %s1743_s17 = smov [#allocation24] }
 0x245   : >>> { %v850_v27 = vpop.xlane.xlu0 %849  ;;  %2836 = vst [vmem:[%s914_s20 + $0x18] sm:$0xff] %v913_v26  ;;  %s1741_s20 = smov [#allocation23] }
 0x246   : >>> { %2833 = vst [vmem:[%s851_s27 + $0x18] sm:$0xff] %v850_v27  ;;  %s917_s27 = smov [#allocation23] }
 0x24c   : >>> { %v920_v34 = vld [vmem:[%s919_s16] sm:$0xff]  ;;  %s948_s16 = smov [#allocation24] }
 0x24d   : >>> { %v930_v37 = vmul.f32 %v927_v30, %v920_v34  ;;  %v933_v38 = vmul.f32 %v928_v31, %v920_v34  ;;  %v935_v39 = vmul.f32 %v925_v28, %v920_v34  ;;  %v938_v40 = vmul.f32 %v926_v29, %v920_v34  ;;  %v1744_v41 = vld [vmem:[%s1743_s17] sm:$0xff]  ;;  %s945_s17 = smov [#allocation23]  ;;  %v2838_v0 = vld [vmem:[%s948_s16 + $0x8] sm:$0xff]  ;;  %s982_s16 = smov [#allocation24] }
 0x24e   : >>> { %v918_v42 = vld [vmem:[%s917_s27] sm:$0xff]  ;;  %v1754_v47 = vmul.f32 %v1751_v35, %v1744_v41  ;;  %v1757_v48 = vmul.f32 %v1752_v36, %v1744_v41  ;;  %v1759_v49 = vmul.f32 %v1749_v32, %v1744_v41  ;;  %v1762_v50 = vmul.f32 %v1750_v33, %v1744_v41  ;;  %s3491_s27 = smov [#allocation12]  ;;  %v2837_v1 = vld [vmem:[%s945_s17 + $0x8] sm:$0xff]  ;;  %s979_s17 = smov [#allocation23] }
 0x24f   : >>> { %v929_v43 = vmul.f32 %v925_v28, %v918_v42  ;;  %v932_v44 = vmul.f32 %v926_v29, %v918_v42  ;;  %v936_v45 = vmul.f32 %v927_v30, %v918_v42  ;;  %v939_v46 = vmul.f32 %v928_v31, %v918_v42  ;;  %v1742_v51 = vld [vmem:[%s1741_s20] sm:$0xff]  ;;  %s1772_s20 = smov [#allocation24] }
 0x250   : >>> { %v1753_v56 = vmul.f32 %v1749_v32, %v1742_v51  ;;  %v1756_v57 = vmul.f32 %v1750_v33, %v1742_v51  ;;  %v1760_v58 = vmul.f32 %v1751_v35, %v1742_v51  ;;  %v1763_v59 = vmul.f32 %v1752_v36, %v1742_v51  ;;  %v2996_v20 = vld [vmem:[%s1772_s20 + $0x8] sm:$0xff]  ;;  %s1803_s20 = smov [#allocation23] }
 0x251   : >>> { %v931_v52 = vsub.f32 %v929_v43, %v930_v37  ;;  %v934_v53 = vsub.f32 %v932_v44, %v933_v38  ;;  %v937_v54 = vadd.f32 %v936_v45, %v935_v39  ;;  %v940_v55 = vadd.f32 %v939_v46, %v938_v40  ;;  %v2848_v38 = vld [vmem:[%s982_s16 + $0x10] sm:$0xff]  ;;  %s1016_s16 = smov [#allocation24] }
 0x252   : >>> { %v1755_v60 = vsub.f32 %v1753_v56, %v1754_v47  ;;  %v1758_v61 = vsub.f32 %v1756_v57, %v1757_v48  ;;  %v1761_v62 = vadd.f32 %v1760_v58, %v1759_v49  ;;  %v1764_v63 = vadd.f32 %v1763_v59, %v1762_v50  ;;  %v2847_v39 = vld [vmem:[%s979_s17 + $0x10] sm:$0xff]  ;;  %s1013_s17 = smov [#allocation23] }
 0x253   : >>> { %941 = vst [vmem:[%s3459_s22] sm:$0xff] %v931_v52  ;;  %942 = vst [vmem:[%s3461_s29] sm:$0xff] %v934_v53  ;;  %s3497_s22 = smov [#allocation13]  ;;  %s3499_s29 = smov [#allocation14]  ;;  %v3005_v56 = vld [vmem:[%s1803_s20 + $0x10] sm:$0xff] }
 0x254   : >>> { %943 = vst [vmem:[%s3463_s11] sm:$0xff] %v937_v54  ;;  %944 = vst [vmem:[%s3465_s30] sm:$0xff] %v940_v55  ;;  %s3501_s11 = smov [#allocation15]  ;;  %s1769_s30 = smov [#allocation23] }
 0x255   : >>> { %1765 = vst [vmem:[%s3469_s14] sm:$0xff] %v1755_v60  ;;  %1766 = vst [vmem:[%s3472_s15] sm:$0xff] %v1758_v61  ;;  %s3504_s14 = smov %s3330_s14  ;;  %s3507_s15 = smov %s3337_s15  ;;  %v2995_v14 = vld [vmem:[%s1769_s30 + $0x8] sm:$0xff] }
 0x256   : >>> { %1767 = vst [vmem:[%s3478_s23] sm:$0xff] %v1761_v62  ;;  %1768 = vst [vmem:[%s3481_s24] sm:$0xff] %v1764_v63  ;;  %s3510_s23 = smov %s3346_s23  ;;  %s3516_s24 = smov %s3353_s24 }
 0x257   : >>> { %s3529_s30 = smov [#allocation13]  ;;  %s1837_s20 = smov [#allocation23] }
 0x25a   : >>> { %v2839_v2 = vld [vmem:[%s3491_s27 + $0x8] sm:$0xff] }
 0x25b   : >>> { %v2840_v3 = vld [vmem:[%s3497_s22 + $0x8] sm:$0xff]  ;;  %v963_v6 = vmul.f32 %v2839_v2, %v2837_v1  ;;  %v969_v9 = vmul.f32 %v2839_v2, %v2838_v0 }
 0x25c   : >>> { %v2841_v4 = vld [vmem:[%s3499_s29 + $0x8] sm:$0xff]  ;;  %v966_v8 = vmul.f32 %v2840_v3, %v2837_v1  ;;  %v972_v12 = vmul.f32 %v2840_v3, %v2838_v0 }
 0x25d   : >>> { %v2842_v5 = vld [vmem:[%s3501_s11 + $0x8] sm:$0xff]  ;;  %v964_v7 = vmul.f32 %v2841_v4, %v2838_v0  ;;  %v970_v11 = vmul.f32 %v2841_v4, %v2837_v1 }
 0x25e   : >>> { %v967_v10 = vmul.f32 %v2842_v5, %v2838_v0  ;;  %v973_v13 = vmul.f32 %v2842_v5, %v2837_v1  ;;  %v2997_v16 = vld [vmem:[%s3504_s14 + $0x8] sm:$0xff] }
 0x25f   : >>> { %v965_v15 = vsub.f32 %v963_v6, %v964_v7  ;;  %v2998_v18 = vld [vmem:[%s3507_s15 + $0x8] sm:$0xff]  ;;  %v971_v22 = vadd.f32 %v970_v11, %v969_v9  ;;  %v1787_v26 = vmul.f32 %v2997_v16, %v2995_v14  ;;  %v1793_v30 = vmul.f32 %v2997_v16, %v2996_v20  ;;  %v2857_v11 = vld [vmem:[%s1013_s17 + $0x18] sm:$0xff]  ;;  %s1049_s17 = smov [#allocation22] }
 0x260   : >>> { %v2999_v19 = vld [vmem:[%s3510_s23 + $0x8] sm:$0xff]  ;;  %v968_v21 = vsub.f32 %v966_v8, %v967_v10  ;;  %v974_v23 = vadd.f32 %v973_v13, %v972_v12  ;;  %v1790_v28 = vmul.f32 %v2998_v18, %v2995_v14  ;;  %v1796_v32 = vmul.f32 %v2998_v18, %v2996_v20  ;;  %v2858_v10 = vld [vmem:[%s1016_s16 + $0x18] sm:$0xff]  ;;  %s1047_s16 = smov [#allocation21] }
 0x261   : >>> { %v3000_v25 = vld [vmem:[%s3516_s24 + $0x8] sm:$0xff]  ;;  %2843 = vst [vmem:[%s3491_s27 + $0x8] sm:$0xff] %v965_v15  ;;  %v1788_v27 = vmul.f32 %v2999_v19, %v2996_v20  ;;  %2845 = vst [vmem:[%s3499_s29 + $0x8] sm:$0xff] %v971_v22  ;;  %v1794_v31 = vmul.f32 %v2999_v19, %v2995_v14  ;;  %s3527_s27 = smov [#allocation12]  ;;  %s3535_s29 = smov [#allocation15] }
 0x262   : >>> { %v1791_v29 = vmul.f32 %v3000_v25, %v2996_v20  ;;  %2844 = vst [vmem:[%s3497_s22 + $0x8] sm:$0xff] %v968_v21  ;;  %2846 = vst [vmem:[%s3501_s11 + $0x8] sm:$0xff] %v974_v23  ;;  %v1797_v33 = vmul.f32 %v3000_v25, %v2995_v14  ;;  %s3533_s22 = smov [#allocation14]  ;;  %s1806_s11 = smov [#allocation24] }
 0x263   : >>> { %v1789_v34 = vsub.f32 %v1787_v26, %v1788_v27  ;;  %v1795_v36 = vadd.f32 %v1794_v31, %v1793_v30  ;;  %v3006_v50 = vld [vmem:[%s1806_s11 + $0x10] sm:$0xff]  ;;  %s3563_s11 = smov [#allocation12] }
 0x264   : >>> { %v1792_v35 = vsub.f32 %v1790_v28, %v1791_v29  ;;  %v1798_v37 = vadd.f32 %v1797_v33, %v1796_v32  ;;  %v3015_v29 = vld [vmem:[%s1837_s20 + $0x18] sm:$0xff]  ;;  %s3631_s20 = smov [#allocation13] }
 0x265   : >>> { %3001 = vst [vmem:[%s3504_s14 + $0x8] sm:$0xff] %v1789_v34  ;;  %3003 = vst [vmem:[%s3510_s23 + $0x8] sm:$0xff] %v1795_v36  ;;  %s3541_s14 = smov %s3330_s14  ;;  %s3550_s23 = smov %s3346_s23 }
 0x266   : >>> { %3002 = vst [vmem:[%s3507_s15 + $0x8] sm:$0xff] %v1792_v35  ;;  %3004 = vst [vmem:[%s3516_s24 + $0x8] sm:$0xff] %v1798_v37  ;;  %s3544_s15 = smov %s3337_s15  ;;  %s3553_s24 = smov %s3353_s24 }
 0x268   : >>> { %v2849_v40 = vld [vmem:[%s3527_s27 + $0x10] sm:$0xff] }
 0x269   : >>> { %v2850_v41 = vld [vmem:[%s3529_s30 + $0x10] sm:$0xff]  ;;  %v997_v44 = vmul.f32 %v2849_v40, %v2847_v39  ;;  %v1003_v45 = vmul.f32 %v2849_v40, %v2848_v38 }
 0x26a   : >>> { %v2851_v42 = vld [vmem:[%s3533_s22 + $0x10] sm:$0xff]  ;;  %v1000_v47 = vmul.f32 %v2850_v41, %v2847_v39  ;;  %v1006_v51 = vmul.f32 %v2850_v41, %v2848_v38 }
 0x26b   : >>> { %v2852_v43 = vld [vmem:[%s3535_s29 + $0x10] sm:$0xff]  ;;  %v998_v46 = vmul.f32 %v2851_v42, %v2848_v38  ;;  %v1004_v49 = vmul.f32 %v2851_v42, %v2847_v39 }
 0x26c   : >>> { %v1001_v48 = vmul.f32 %v2852_v43, %v2848_v38  ;;  %v1007_v52 = vmul.f32 %v2852_v43, %v2847_v39  ;;  %v3007_v57 = vld [vmem:[%s3541_s14 + $0x10] sm:$0xff] }
 0x26d   : >>> { %v999_v53 = vsub.f32 %v997_v44, %v998_v46  ;;  %v1005_v55 = vadd.f32 %v1004_v49, %v1003_v45  ;;  %v3008_v58 = vld [vmem:[%s3544_s15 + $0x10] sm:$0xff]  ;;  %v1821_v62 = vmul.f32 %v3007_v57, %v3005_v56  ;;  %v1827_v0 = vmul.f32 %v3007_v57, %v3006_v50  ;;  %v3606_v49 = vld [vmem:[%s1049_s17] ss:$0 sm:$0xff]  ;;  %s3638_s17 = smov [#allocation15] }
 0x26e   : >>> { %v1002_v54 = vsub.f32 %v1000_v47, %v1001_v48  ;;  %v1008_v59 = vadd.f32 %v1007_v52, %v1006_v51  ;;  %v3009_v60 = vld [vmem:[%s3550_s23 + $0x10] sm:$0xff]  ;;  %v1824_v63 = vmul.f32 %v3008_v58, %v3005_v56  ;;  %v1830_v4 = vmul.f32 %v3008_v58, %v3006_v50  ;;  %v3604_v48 = vld [vmem:[%s1047_s16] ss:$0 sm:$0xff]  ;;  %s3636_s16 = smov [#allocation14] }
 0x26f   : >>> { %v3010_v61 = vld [vmem:[%s3553_s24 + $0x10] sm:$0xff]  ;;  %2853 = vst [vmem:[%s3527_s27 + $0x10] sm:$0xff] %v999_v53  ;;  %2855 = vst [vmem:[%s3533_s22 + $0x10] sm:$0xff] %v1005_v55  ;;  %v1822_v1 = vmul.f32 %v3009_v60, %v3006_v50  ;;  %v1828_v3 = vmul.f32 %v3009_v60, %v3005_v56  ;;  %s3565_s27 = smov [#allocation14]  ;;  %s3572_s22 = smov [#allocation15] }
 0x270   : >>> { %v1825_v2 = vmul.f32 %v3010_v61, %v3006_v50  ;;  %2854 = vst [vmem:[%s3529_s30 + $0x10] sm:$0xff] %v1002_v54  ;;  %2856 = vst [vmem:[%s3535_s29 + $0x10] sm:$0xff] %v1008_v59  ;;  %v1831_v5 = vmul.f32 %v3010_v61, %v3005_v56  ;;  %s3570_s30 = smov [#allocation13]  ;;  %s1840_s29 = smov [#allocation24] }
 0x271   : >>> { %v1823_v6 = vsub.f32 %v1821_v62, %v1822_v1  ;;  %v1829_v8 = vadd.f32 %v1828_v3, %v1827_v0  ;;  %v3016_v26 = vld [vmem:[%s1840_s29 + $0x18] sm:$0xff]  ;;  %s3629_s29 = smov [#allocation12] }
 0x272   : >>> { %v1826_v7 = vsub.f32 %v1824_v63, %v1825_v2  ;;  %v1832_v9 = vadd.f32 %v1831_v5, %v1830_v4 }
 0x273   : >>> { %3011 = vst [vmem:[%s3541_s14 + $0x10] sm:$0xff] %v1823_v6  ;;  %3013 = vst [vmem:[%s3550_s23 + $0x10] sm:$0xff] %v1829_v8  ;;  %s3576_s14 = smov %s3330_s14  ;;  %s3585_s23 = smov %s3346_s23 }
 0x274   : >>> { %3012 = vst [vmem:[%s3544_s15 + $0x10] sm:$0xff] %v1826_v7  ;;  %3014 = vst [vmem:[%s3553_s24 + $0x10] sm:$0xff] %v1832_v9  ;;  %s3582_s15 = smov %s3337_s15  ;;  %s3589_s24 = smov %s3353_s24 }
 0x276   : >>> { %v2859_v12 = vld [vmem:[%s3563_s11 + $0x18] sm:$0xff] }
 0x277   : >>> { %v2861_v13 = vld [vmem:[%s3565_s27 + $0x18] sm:$0xff]  ;;  %v1031_v16 = vmul.f32 %v2859_v12, %v2857_v11  ;;  %v1037_v19 = vmul.f32 %v2859_v12, %v2858_v10 }
 0x278   : >>> { %v2860_v14 = vld [vmem:[%s3570_s30 + $0x18] sm:$0xff]  ;;  %v1032_v18 = vmul.f32 %v2861_v13, %v2858_v10  ;;  %v1038_v20 = vmul.f32 %v2861_v13, %v2857_v11 }
 0x279   : >>> { %v2862_v15 = vld [vmem:[%s3572_s22 + $0x18] sm:$0xff]  ;;  %v1034_v23 = vmul.f32 %v2860_v14, %v2857_v11  ;;  %v1040_v25 = vmul.f32 %v2860_v14, %v2858_v10 }
 0x27a   : >>> { %v1035_v21 = vmul.f32 %v2862_v15, %v2858_v10  ;;  %v1041_v22 = vmul.f32 %v2862_v15, %v2857_v11  ;;  %v1033_v27 = vsub.f32 %v1031_v16, %v1032_v18  ;;  %v1039_v28 = vadd.f32 %v1038_v20, %v1037_v19  ;;  %v3017_v30 = vld [vmem:[%s3576_s14 + $0x18] sm:$0xff] }
 0x27b   : >>> { %v3018_v31 = vld [vmem:[%s3582_s15 + $0x18] sm:$0xff]  ;;  %v1855_v36 = vmul.f32 %v3017_v30, %v3015_v29  ;;  %v1861_v39 = vmul.f32 %v3017_v30, %v3016_v26 }
 0x27c   : >>> { %v3019_v32 = vld [vmem:[%s3585_s23 + $0x18] sm:$0xff]  ;;  %v1036_v33 = vsub.f32 %v1034_v23, %v1035_v21  ;;  %v1042_v34 = vadd.f32 %v1041_v22, %v1040_v25  ;;  %2863 = vst [vmem:[%s3563_s11 + $0x18] sm:$0xff] %v1033_v27  ;;  %v1858_v38 = vmul.f32 %v3018_v31, %v3015_v29  ;;  %2865 = vst [vmem:[%s3565_s27 + $0x18] sm:$0xff] %v1039_v28  ;;  %s3600_s11 = smov [#allocation12]  ;;  %s3602_s27 = smov [#allocation14] }
 0x27d   : >>> { %v3020_v35 = vld [vmem:[%s3589_s24 + $0x18] sm:$0xff]  ;;  %v1856_v37 = vmul.f32 %v3019_v32, %v3016_v26  ;;  %v1862_v41 = vmul.f32 %v3019_v32, %v3015_v29  ;;  %v1864_v42 = vmul.f32 %v3018_v31, %v3016_v26 }
 0x27e   : >>> { %v1859_v40 = vmul.f32 %v3020_v35, %v3016_v26  ;;  %v1865_v43 = vmul.f32 %v3020_v35, %v3015_v29  ;;  %2864 = vst [vmem:[%s3570_s30 + $0x18] sm:$0xff] %v1036_v33  ;;  %2866 = vst [vmem:[%s3572_s22 + $0x18] sm:$0xff] %v1042_v34  ;;  %s3611_s30 = smov [#allocation13]  ;;  %s3613_s22 = smov [#allocation15] }
 0x27f   : >>> { %v1857_v44 = vsub.f32 %v1855_v36, %v1856_v37  ;;  %v1863_v46 = vadd.f32 %v1862_v41, %v1861_v39 }
 0x280   : >>> { %v1860_v45 = vsub.f32 %v1858_v38, %v1859_v40  ;;  %v1866_v47 = vadd.f32 %v1865_v43, %v1864_v42 }
 0x281   : >>> { %3021 = vst [vmem:[%s3576_s14 + $0x18] sm:$0xff] %v1857_v44  ;;  %3023 = vst [vmem:[%s3585_s23 + $0x18] sm:$0xff] %v1863_v46  ;;  %s3619_s14 = smov %s3330_s14  ;;  %s3641_s23 = smov %s3346_s23 }
 0x282   : >>> { %3022 = vst [vmem:[%s3582_s15 + $0x18] sm:$0xff] %v1860_v45  ;;  %3024 = vst [vmem:[%s3589_s24 + $0x18] sm:$0xff] %v1866_v47  ;;  %s3652_s15 = smov %s3337_s15  ;;  %s3681_s24 = smov %s3353_s24 }
 0x283   : >>> { %v1055_v50 = vld [vmem:[%s3600_s11] sm:$0xff] }
 0x284   : >>> { %v1057_v51 = vld [vmem:[%s3602_s27] sm:$0xff]  ;;  %v1059_v53 = vmul.f32 %v1055_v50, %v3604_v48  ;;  %v1062_v54 = vmul.f32 %v1055_v50, %v3606_v49 }
 0x285   : >>> { %v1056_v52 = vld [vmem:[%s3611_s30] sm:$0xff]  ;;  %v1065_v56 = vmul.f32 %v1057_v51, %v3604_v48  ;;  %v1068_v57 = vmul.f32 %v1057_v51, %v3606_v49 }
 0x286   : >>> { %v1058_v55 = vld [vmem:[%s3613_s22] sm:$0xff]  ;;  %v1060_v58 = vmul.f32 %v1056_v52, %v3606_v49  ;;  %v1063_v59 = vmul.f32 %v1056_v52, %v3604_v48 }
 0x287   : >>> { %v1066_v60 = vmul.f32 %v1058_v55, %v3606_v49  ;;  %v1069_v61 = vmul.f32 %v1058_v55, %v3604_v48 }
 0x288   : >>> { %v1873_v62 = vld [vmem:[%s3619_s14] ss:$0 sm:$0xff]  ;;  %v3026_v0 = vld [vmem:[%s3619_s14 + $0x7] ss:$0 sm:$0xff]  ;;  %v1061_v1 = vsub.f32 %v1059_v53, %v1060_v58  ;;  %v1064_v2 = vadd.f32 %v1063_v59, %v1062_v54  ;;  %v3027_v6 = vld [vmem:[%s3619_s14 + $0x7] sm:$0xfe] }
 0x289   : >>> { %v3025_v63 = vld [vmem:[%s3619_s14 - $0x1] sm:$0xfe]  ;;  %v1067_v3 = vsub.f32 %v1065_v56, %v1066_v60  ;;  %v1070_v4 = vadd.f32 %v1069_v61, %v1068_v57  ;;  %v3028_v7 = vld [vmem:[%s3619_s14 + $0xf] ss:$0 sm:$0xff]  ;;  %v3030_v8 = vld [vmem:[%s3619_s14 + $0xf] sm:$0xfe]  ;;  %v1891_v9 = vsel %vm1581_vm11, %v3026_v0, %v3027_v6 }
 0x28a   : >>> { %v1880_v5 = vsel %vm1581_vm11, %v1873_v62, %v3025_v63  ;;  %v1902_v10 = vsel %vm1581_vm11, %v3028_v7, %v3030_v8  ;;  %v3031_v11 = vld [vmem:[%s3619_s14 + $0x17] ss:$0 sm:$0xff]  ;;  %v3033_v12 = vld [vmem:[%s3619_s14 + $0x17] sm:$0xfe]  ;;  %v3034_v13 = vld [vmem:[%s3619_s14 + $0x1f] ss:$0 sm:$0xff]  ;;  %1071 = vst [vmem:[%s3600_s11] sm:$0xff] %v1061_v1 }
 0x28b   : >>> { %1883 = vst [vmem:[%s3619_s14] sm:$0xff] %v1880_v5  ;;  %1072 = vst [vmem:[%s3611_s30] sm:$0xff] %v1064_v2  ;;  %v1913_v14 = vsel %vm1581_vm11, %v3031_v11, %v3033_v12  ;;  %v1917_v15 = vld [vmem:[%s3641_s23] ss:$0 sm:$0xff]  ;;  %v3037_v16 = vld [vmem:[%s3641_s23 + $0x19] sm:$0x7f]  ;;  %s1103_s11 = smov [#allocation12]  ;;  %s1107_s30 = smov [#allocation14] }
 0x28c   : >>> { %1073 = vst [vmem:[%s3602_s27] sm:$0xff] %v1067_v3  ;;  %1074 = vst [vmem:[%s3613_s22] sm:$0xff] %v1070_v4  ;;  %v3038_v18 = vld [vmem:[%s3641_s23 + $0x18] ss:$0 sm:$0xff]  ;;  %v1926_v19 = vsel %vm4282_vm12, %v3034_v13, %v3037_v16  ;;  %v3040_v20 = vld [vmem:[%s3641_s23 + $0x11] sm:$0x7f]  ;;  %s1105_s27 = smov [#allocation13]  ;;  %s1109_s22 = smov [#allocation15] }
 0x28d   : >>> { %3029 = vst [vmem:[%s3619_s14 + $0x8] sm:$0xff] %v1891_v9  ;;  %3032 = vst [vmem:[%s3619_s14 + $0x10] sm:$0xff] %v1902_v10  ;;  %v3041_v21 = vld [vmem:[%s3641_s23 + $0x10] ss:$0 sm:$0xff]  ;;  %v3043_v22 = vld [vmem:[%s3641_s23 + $0x9] sm:$0x7f]  ;;  %v1935_v23 = vsel %vm4282_vm12, %v3038_v18, %v3040_v20 }
 0x28e   : >>> { %3035 = vst [vmem:[%s3619_s14 + $0x18] sm:$0xff] %v1913_v14  ;;  %3036 = vst [vmem:[%s3619_s14 + $0x1] sm:$0x1] %v1917_v15  ;;  %v1944_v25 = vsel %vm4282_vm12, %v3041_v21, %v3043_v22  ;;  %v3044_v26 = vld [vmem:[%s3641_s23 + $0x8] ss:$0 sm:$0xff] }
 0x28f   : >>> { %3039 = vst [vmem:[%s3641_s23 + $0x18] sm:$0xff] %v1926_v19  ;;  %v3046_v27 = vld [vmem:[%s3641_s23 + $0x1] sm:$0x7f]  ;;  %v1957_v28 = vld [vmem:[%s3652_s15] ss:$0 sm:$0xff]  ;;  %3042 = vst [vmem:[%s3641_s23 + $0x10] sm:$0xff] %v1935_v23 }
 0x290   : >>> { %3045 = vst [vmem:[%s3641_s23 + $0x8] sm:$0xff] %v1944_v25  ;;  %v1952_v29 = vsel %vm4282_vm12, %v3044_v26, %v3046_v27  ;;  %v3047_v30 = vld [vmem:[%s3652_s15 - $0x1] sm:$0xfe]  ;;  %v3048_v31 = vld [vmem:[%s3652_s15 + $0x7] ss:$0 sm:$0xff] }
 0x291   : >>> { %v3049_v32 = vld [vmem:[%s3652_s15 + $0x7] sm:$0xfe]  ;;  %1954 = vst [vmem:[%s3641_s23] sm:$0xff] %v1952_v29  ;;  %v1964_v33 = vsel %vm1581_vm11, %v1957_v28, %v3047_v30  ;;  %v3050_v35 = vld [vmem:[%s3652_s15 + $0xf] ss:$0 sm:$0xff]  ;;  %v3052_v36 = vld [vmem:[%s3652_s15 + $0xf] sm:$0xfe] }
 0x292   : >>> { %v1975_v34 = vsel %vm1581_vm11, %v3048_v31, %v3049_v32  ;;  %v3053_v37 = vld [vmem:[%s3652_s15 + $0x17] ss:$0 sm:$0xff]  ;;  %1967 = vst [vmem:[%s3652_s15] sm:$0xff] %v1964_v33  ;;  %v1986_v38 = vsel %vm1581_vm11, %v3050_v35, %v3052_v36  ;;  %v3055_v39 = vld [vmem:[%s3652_s15 + $0x17] sm:$0xfe]  ;;  %v3056_v40 = vld [vmem:[%s3652_s15 + $0x1f] ss:$0 sm:$0xff] }
 0x293   : >>> { %3051 = vst [vmem:[%s3652_s15 + $0x8] sm:$0xff] %v1975_v34  ;;  %v2001_v41 = vld [vmem:[%s3681_s24] ss:$0 sm:$0xff]  ;;  %3054 = vst [vmem:[%s3652_s15 + $0x10] sm:$0xff] %v1986_v38  ;;  %v1997_v42 = vsel %vm1581_vm11, %v3053_v37, %v3055_v39  ;;  %v3059_v43 = vld [vmem:[%s3681_s24 + $0x19] sm:$0x7f] }
 0x294   : >>> { %3058 = vst [vmem:[%s3652_s15 + $0x1] sm:$0x1] %v2001_v41  ;;  %v3060_v44 = vld [vmem:[%s3681_s24 + $0x18] ss:$0 sm:$0xff]  ;;  %v3062_v45 = vld [vmem:[%s3681_s24 + $0x11] sm:$0x7f]  ;;  %v2010_v46 = vsel %vm4282_vm12, %v3056_v40, %v3059_v43 }
 0x295   : >>> { %3057 = vst [vmem:[%s3652_s15 + $0x18] sm:$0xff] %v1997_v42  ;;  %v2019_v47 = vsel %vm4282_vm12, %v3060_v44, %v3062_v45  ;;  %v3063_v50 = vld [vmem:[%s3681_s24 + $0x10] ss:$0 sm:$0xff]  ;;  %v3065_v51 = vld [vmem:[%s3681_s24 + $0x9] sm:$0x7f]  ;;  %3061 = vst [vmem:[%s3681_s24 + $0x18] sm:$0xff] %v2010_v46 }
 0x296   : >>> { %v3066_v52 = vld [vmem:[%s3681_s24 + $0x8] ss:$0 sm:$0xff]  ;;  %3064 = vst [vmem:[%s3681_s24 + $0x10] sm:$0xff] %v2019_v47  ;;  %v2028_v53 = vsel %vm4282_vm12, %v3063_v50, %v3065_v51  ;;  %v3068_v54 = vld [vmem:[%s3681_s24 + $0x1] sm:$0x7f]  ;;  %v1214_v42 = vadd.s32 8, %v3762_v17 }
 0x297   : >>> { %v2867_v55 = vld [vmem:[%s3629_s29 + $0x8] sm:$0xff]  ;;  %3067 = vst [vmem:[%s3681_s24 + $0x8] sm:$0xff] %v2028_v53  ;;  %v2036_v57 = vsel %vm4282_vm12, %v3066_v52, %v3068_v54  ;;  %v1221_v43 = vadd.s32 16, %v3762_v17  ;;  %v3777_v17 = vmov %v3316_v17  ;;  %v1186_v44 = vadd.s32 16, %v1166_v17 }
 0x298   : >>> { %v2868_v56 = vld [vmem:[%s3631_s20 + $0x8] sm:$0xff]  ;;  %v1087_v58 = vmul.f32 %v2867_v55, %v3604_v48  ;;  %v1090_v60 = vmul.f32 %v2867_v55, %v3606_v49  ;;  %2038 = vst [vmem:[%s3681_s24] sm:$0xff] %v2036_v57  ;;  %v1194_v45 = vadd.s32 24, %v1166_v17  ;;  %v1248_v46 = vadd.s32 8, %v3777_v17 }
 0x299   : >>> { %v1088_v59 = vmul.f32 %v2868_v56, %v3606_v49  ;;  %v2869_v61 = vld [vmem:[%s3636_s16 + $0x8] sm:$0xff]  ;;  %v1091_v63 = vmul.f32 %v2868_v56, %v3604_v48  ;;  %v1255_v47 = vadd.s32 16, %v3777_v17  ;;  %v1262_v50 = vadd.s32 24, %v3777_v17 }
 0x29a   : >>> { %v2870_v62 = vld [vmem:[%s3638_s17 + $0x8] sm:$0xff]  ;;  %v1093_v0 = vmul.f32 %v2869_v61, %v3604_v48  ;;  %v1096_v2 = vmul.f32 %v2869_v61, %v3606_v49  ;;  %vm1215_vm14 = vcmp.eq.s32.totalorder %v1214_v42, %v1201_v24  ;;  %vm1222_vm15 = vcmp.eq.s32.totalorder %v1221_v43, %v1201_v24 }
 0x29b   : >>> { %v1094_v1 = vmul.f32 %v2870_v62, %v3606_v49  ;;  %v1089_v3 = vsub.f32 %v1087_v58, %v1088_v59  ;;  %v1097_v4 = vmul.f32 %v2870_v62, %v3604_v48  ;;  %v1092_v5 = vadd.f32 %v1091_v63, %v1090_v60 }
 0x29c   : >>> { %v3794_v24 = vmov %v3320_v24  ;;  %vm1187_vm3 = vcmp.eq.s32.totalorder %v1186_v44, %v1163_v24  ;;  %vm1195_vm4 = vcmp.eq.s32.totalorder %v1194_v45, %v1163_v24  ;;  %vm1242_vm5 = vcmp.eq.s32.totalorder %v3777_v17, %v3786_v24 }
 0x29d   : >>> { %v1095_v6 = vsub.f32 %v1093_v0, %v1094_v1  ;;  %2871 = vst [vmem:[%s3629_s29 + $0x8] sm:$0xff] %v1089_v3  ;;  %v1098_v7 = vadd.f32 %v1097_v4, %v1096_v2  ;;  %2872 = vst [vmem:[%s3631_s20 + $0x8] sm:$0xff] %v1092_v5  ;;  %s1131_s29 = smov [#allocation12]  ;;  %s1133_s20 = smov [#allocation13]  ;;  %vm1249_vm6 = vcmp.eq.s32.totalorder %v1248_v46, %v3786_v24 }
 0x29e   : >>> { %vm1256_vm7 = vcmp.eq.s32.totalorder %v1255_v47, %v3786_v24  ;;  %vm1263_vm9 = vcmp.eq.s32.totalorder %v1262_v50, %v3786_v24 }
 0x29f   : >>> { %2873 = vst [vmem:[%s3636_s16 + $0x8] sm:$0xff] %v1095_v6  ;;  %2874 = vst [vmem:[%s3638_s17 + $0x8] sm:$0xff] %v1098_v7  ;;  %s1135_s16 = smov [#allocation14]  ;;  %s1137_s17 = smov [#allocation15] }
 0x2a4   : >>> { %v2875_v8 = vld [vmem:[%s1103_s11 + $0x10] sm:$0xff] }
 0x2a5   : >>> { %v2876_v9 = vld [vmem:[%s1105_s27 + $0x10] sm:$0xff]  ;;  %v1115_v10 = vmul.f32 %v2875_v8, %v3604_v48  ;;  %v1118_v11 = vmul.f32 %v2875_v8, %v3606_v49 }
 0x2a6   : >>> { %v2877_v12 = vld [vmem:[%s1107_s30 + $0x10] sm:$0xff]  ;;  %v1116_v13 = vmul.f32 %v2876_v9, %v3606_v49  ;;  %v1119_v14 = vmul.f32 %v2876_v9, %v3604_v48 }
 0x2a7   : >>> { %v2878_v15 = vld [vmem:[%s1109_s22 + $0x10] sm:$0xff]  ;;  %v1121_v16 = vmul.f32 %v2877_v12, %v3604_v48  ;;  %v1124_v18 = vmul.f32 %v2877_v12, %v3606_v49 }
 0x2a8   : >>> { %v1122_v19 = vmul.f32 %v2878_v15, %v3606_v49  ;;  %v1125_v20 = vmul.f32 %v2878_v15, %v3604_v48  ;;  %v1117_v21 = vsub.f32 %v1115_v10, %v1116_v13  ;;  %v1120_v22 = vadd.f32 %v1119_v14, %v1118_v11 }
 0x2aa   : >>> { %v1123_v23 = vsub.f32 %v1121_v16, %v1122_v19  ;;  %v1126_v25 = vadd.f32 %v1125_v20, %v1124_v18  ;;  %2879 = vst [vmem:[%s1103_s11 + $0x10] sm:$0xff] %v1117_v21  ;;  %2880 = vst [vmem:[%s1105_s27 + $0x10] sm:$0xff] %v1120_v22  ;;  %s1160_s11 = smov [#allocation19]  ;;  %s3791_s27 = smov [#allocation13] }
 0x2ab   : >>> { %v1167_v53 = vld [vmem:[%s1160_s11] ss:$0 sm:$0xff]  ;;  %s3201_s11 = smov 1  }
 0x2ac   : >>> { %2881 = vst [vmem:[%s1107_s30 + $0x10] sm:$0xff] %v1123_v23  ;;  %2882 = vst [vmem:[%s1109_s22 + $0x10] sm:$0xff] %v1126_v25  ;;  %s1267_s30 = smov [#allocation20]  ;;  %s3799_s22 = smov [#allocation12] }
 0x2ad   : >>> { %v1274_v58 = vld [vmem:[%s1267_s30] ss:$0 sm:$0xff]  ;;  %s3896_s30 = smov [#allocation14] }
 0x2b1   : >>> { %v2883_v26 = vld [vmem:[%s1131_s29 + $0x18] sm:$0xff] }
 0x2b2   : >>> { %v2884_v27 = vld [vmem:[%s1133_s20 + $0x18] sm:$0xff]  ;;  %v1146_v29 = vmul.f32 %v2883_v26, %v3606_v49  ;;  %v1143_v31 = vmul.f32 %v2883_v26, %v3604_v48 }
 0x2b3   : >>> { %v1144_v28 = vmul.f32 %v2884_v27, %v3606_v49  ;;  %v1147_v30 = vmul.f32 %v2884_v27, %v3604_v48  ;;  %v2885_v32 = vld [vmem:[%s1135_s16 + $0x18] sm:$0xff] }
 0x2b4   : >>> { %v2886_v33 = vld [vmem:[%s1137_s17 + $0x18] sm:$0xff]  ;;  %v1149_v34 = vmul.f32 %v2885_v32, %v3604_v48  ;;  %v1152_v36 = vmul.f32 %v2885_v32, %v3606_v49 }
 0x2b5   : >>> { %v1150_v35 = vmul.f32 %v2886_v33, %v3606_v49  ;;  %v1153_v37 = vmul.f32 %v2886_v33, %v3604_v48  ;;  %v1148_v38 = vadd.f32 %v1147_v30, %v1146_v29  ;;  %v1145_v39 = vsub.f32 %v1143_v31, %v1144_v28 }
 0x2b6   : >>> { %v1228_v49 = vadd.s32 24, %v3762_v17  ;;  %v1178_v48 = vadd.s32 8, %v1166_v17  ;;  %v3781_v17 = vmov %v3316_v17 }
 0x2b7   : >>> { %v1151_v40 = vsub.f32 %v1149_v34, %v1150_v35  ;;  %v1154_v41 = vadd.f32 %v1153_v37, %v1152_v36  ;;  %2888 = vst [vmem:[%s1133_s20 + $0x18] sm:$0xff] %v1148_v38  ;;  %2887 = vst [vmem:[%s1131_s29 + $0x18] sm:$0xff] %v1145_v39  ;;  %v3797_v51 = vadd.s32 8, %v3781_v17  ;;  %v1293_v52 = vadd.s32 16, %v3781_v17  ;;  %s3802_s29 = smov [#allocation14]  ;;  %s3813_s20 = smov [#allocation15] }
 0x2b8   : >>> { %vm1229_vm0 = vcmp.eq.s32.totalorder %v1228_v49, %v1201_v24  ;;  %vm1179_vm2 = vcmp.eq.s32.totalorder %v1178_v48, %v1163_v24  ;;  %v1301_v54 = vadd.s32 24, %v3781_v17  ;;  %vm1278_vm10 = vcmp.eq.s32.totalorder %v3781_v17, %v3794_v24 }
 0x2b9   : >>> { %2889 = vst [vmem:[%s1135_s16 + $0x18] sm:$0xff] %v1151_v40  ;;  %2890 = vst [vmem:[%s1137_s17 + $0x18] sm:$0xff] %v1154_v41  ;;  %vm1286_vm12 = vcmp.eq.s32.totalorder %v3797_v51, %v3794_v24  ;;  %s3877_s16 = smov [#allocation13]  ;;  %s3880_s17 = smov [#allocation12] }
 0x2be   : >>> { %v1205_v55 = vld [vmem:[%s3791_s27] sm:$0xff]  ;;  %v2897_v56 = vld [vmem:[%s3791_s27 + $0x8] sm:$0xff]  ;;  %v2899_v57 = vld [vmem:[%s3791_s27 + $0x10] sm:$0xff] }
 0x2bf   : >>> { %v1209_v59 = vsel %vm1208_vm13, 0.0, %v1205_v55  ;;  %v1216_v60 = vsel %vm1215_vm14, 0.0, %v2897_v56  ;;  %v1223_v61 = vsel %vm1222_vm15, 0.0, %v2899_v57  ;;  %v2901_v62 = vld [vmem:[%s3791_s27 + $0x18] sm:$0xff]  ;;  %v1168_v63 = vld [vmem:[%s3799_s22] sm:$0xff]  ;;  %v2891_v0 = vld [vmem:[%s3799_s22 + $0x8] sm:$0xff]  ;;  %vm1294_vm13 = vcmp.eq.s32.totalorder %v1293_v52, %v3794_v24 }
 0x2c0   : >>> { %1210 = vst [vmem:[%s3791_s27] sm:$0xff] %v1209_v59  ;;  %2898 = vst [vmem:[%s3791_s27 + $0x8] sm:$0xff] %v1216_v60  ;;  %v1230_v1 = vsel %vm1229_vm0, 0.0, %v2901_v62  ;;  %v1172_v2 = vsel %vm1171_vm1, %v1167_v53, %v1168_v63  ;;  %v1180_v3 = vsel %vm1179_vm2, %v1167_v53, %v2891_v0  ;;  %v2893_v4 = vld [vmem:[%s3799_s22 + $0x10] sm:$0xff]  ;;  %v2895_v5 = vld [vmem:[%s3799_s22 + $0x18] sm:$0xff]  ;;  %vm1302_vm14 = vcmp.eq.s32.totalorder %v1301_v54, %v3794_v24 }
 0x2c1   : >>> { %2900 = vst [vmem:[%s3791_s27 + $0x10] sm:$0xff] %v1223_v61  ;;  %v1239_v6 = vld [vmem:[%s3802_s29] sm:$0xff]  ;;  %2902 = vst [vmem:[%s3791_s27 + $0x18] sm:$0xff] %v1230_v1  ;;  %v1188_v7 = vsel %vm1187_vm3, %v1167_v53, %v2893_v4  ;;  %v1196_v8 = vsel %vm1195_vm4, %v1167_v53, %v2895_v5  ;;  %v2903_v10 = vld [vmem:[%s3802_s29 + $0x8] sm:$0xff]  ;;  %s3887_s27 = smov [#allocation12]  ;;  %vm1320_vm15 = vcmp.eq.s32.totalorder %v3320_v24, 1 }
 0x2c2   : >>> { %1173 = vst [vmem:[%s3799_s22] sm:$0xff] %v1172_v2  ;;  %2892 = vst [vmem:[%s3799_s22 + $0x8] sm:$0xff] %v1180_v3  ;;  %v1243_v9 = vsel %vm1242_vm5, 0.0, %v1239_v6  ;;  %v2905_v11 = vld [vmem:[%s3802_s29 + $0x10] sm:$0xff]  ;;  %v2907_v12 = vld [vmem:[%s3802_s29 + $0x18] sm:$0xff]  ;;  %v1250_v13 = vsel %vm1249_vm6, 0.0, %v2903_v10  ;;  %vm1333_vm0 = vcmp.eq.s32.totalorder %v3320_v24, 31 }
 0x2c3   : >>> { %2894 = vst [vmem:[%s3799_s22 + $0x10] sm:$0xff] %v1188_v7  ;;  %2896 = vst [vmem:[%s3799_s22 + $0x18] sm:$0xff] %v1196_v8  ;;  %v1257_v14 = vsel %vm1256_vm7, 0.0, %v2905_v11  ;;  %v1264_v15 = vsel %vm1263_vm9, 0.0, %v2907_v12  ;;  %v1275_v16 = vld [vmem:[%s3813_s20] sm:$0xff]  ;;  %v2909_v18 = vld [vmem:[%s3813_s20 + $0x8] sm:$0xff] }
 0x2c4   : >>> { %1244 = vst [vmem:[%s3802_s29] sm:$0xff] %v1243_v9  ;;  %v2911_v19 = vld [vmem:[%s3813_s20 + $0x10] sm:$0xff]  ;;  %2904 = vst [vmem:[%s3802_s29 + $0x8] sm:$0xff] %v1250_v13  ;;  %v1279_v20 = vsel %vm1278_vm10, %v1274_v58, %v1275_v16  ;;  %v1287_v21 = vsel %vm1286_vm12, %v1274_v58, %v2909_v18  ;;  %v2913_v23 = vld [vmem:[%s3813_s20 + $0x18] sm:$0xff]  ;;  %s4283_s22 = smov 127   ;;  %vm1316_vm12 = vcmp.eq.s32.totalorder %v3320_v24, 0  ;;  %vm4303_vm1 = vcmp.eq.s32.totalorder %v3316_v17, 7 }
 0x2c5   : >>> { %2906 = vst [vmem:[%s3802_s29 + $0x10] sm:$0xff] %v1257_v14  ;;  %2908 = vst [vmem:[%s3802_s29 + $0x18] sm:$0xff] %v1264_v15  ;;  %v1295_v22 = vsel %vm1294_vm13, %v1274_v58, %v2911_v19  ;;  %v1303_v25 = vsel %vm1302_vm14, %v1274_v58, %v2913_v23  ;;  %s3899_s29 = smov [#allocation12]  ;;  %v435_v17 = vmov (%p624_p9), %v3316_v17  ;;  %v481_v24 = vmov (%p624_p9), %v3320_v24 }
 0x2c6   : >>> { %1280 = vst [vmem:[%s3813_s20] sm:$0xff] %v1279_v20  ;;  %2910 = vst [vmem:[%s3813_s20 + $0x8] sm:$0xff] %v1287_v21  ;;  %v484_v17 = vmov (%p624_p9), %v3316_v17  ;;  %v432_v24 = vmov (%p624_p9), %v3320_v24 }
 0x2c7   : >>> { %2912 = vst [vmem:[%s3813_s20 + $0x10] sm:$0xff] %v1295_v22  ;;  %2914 = vst [vmem:[%s3813_s20 + $0x18] sm:$0xff] %v1303_v25  ;;  %s3909_s20 = smov [#allocation13]  ;;  %vm447_vm9 = vcmp.eq.s32.totalorder (%p624_p9), %v435_v17, %v432_v24 }
 0x2c8   : >>> { %v1307_v26 = vld [vmem:[%s3877_s16] sm:$0xff]  ;;  %v2915_v31 = vld [vmem:[%s3909_s20 + $0x8] sm:$0xff]  ;;  %v2919_v34 = vld [vmem:[%s3924_s0 + $0x10] sm:$0xff] }
 0x2c9   : >>> { %1308 = vrot.lane.b32.xlu1 %v1307_v26, %s3201_s11  ;;  %v2923_v38 = vld [vmem:[%s3948_s10 + $0x18] sm:$0xff]  ;;  %vm4305_vm2 = vmmov %vm4303_vm1 }
 0x2ca   : >>> { %v3885_v27 = vld [vmem:[%s3880_s17] sm:$0xff]  ;;  %v3892_v28 = vld [vmem:[%s3887_s27 + $0x8] sm:$0xff]  ;;  %v3907_v30 = vld [vmem:[%s3899_s29 + $0x10] sm:$0xff] }
 0x2cb   : >>> { %1312 = vrot.lane.b32.xlu0 %v3885_v27, %s3201_s11  ;;  %v3937_v35 = vld [vmem:[%s3931_s2 + $0x18] sm:$0xff]  ;;  %vm4306_vm3 = vmmov %vm4303_vm1 }
 0x2cc   : >>> { %v3902_v29 = vld [vmem:[%s3896_s30] sm:$0xff]  ;;  %v3918_v32 = vld [vmem:[%s3913_s21 + $0x8] sm:$0xff]  ;;  %v3942_v36 = vld [vmem:[%s3934_s3 + $0x10] sm:$0xff] }
 0x2cd   : >>> { %1344 = vrot.lane.b32.xlu1 %v3892_v28, %s3201_s11  ;;  %v3966_v40 = vld [vmem:[%s3960_s9 + $0x18] sm:$0xff]  ;;  %vm4307_vm4 = vmmov %vm4303_vm1 }
 0x2ce   : >>> { %v2933_v37 = vld [vmem:[%s3944_s18 + $0x8] sm:$0xff]  ;;  %v2937_v39 = vld [vmem:[%s3954_s13 + $0x10] sm:$0xff]  ;;  %v2941_v41 = vld [vmem:[%s3963_s8 + $0x18] sm:$0xff] }
 0x2cf   : >>> { %1329 = vrot.lane.b32.xlu0 %v1307_v26, %s4283_s22  ;;  %s3920_s22 = smov [#allocation15]  ;;  %vm4308_vm5 = vmmov %vm4303_vm1 }
 0x2d0   : >>> { %v1441_v33 = vld [vmem:[%s3920_s22] sm:$0xff]  ;;  %vm4309_vm6 = vmmov %vm4303_vm1 }
 0x2d1   : >>> { %1446 = vrot.lane.b32.xlu1 %v3902_v29, %s3201_s11  ;;  %vm4310_vm7 = vmmov %vm4303_vm1 }
 0x2d3   : >>> { %1376 = vrot.lane.b32.xlu0 %v3907_v30, %s3201_s11 }
 0x2d5   : >>> { %1340 = vrot.lane.b32.xlu1 %v2915_v31, %s3201_s11 }
 0x2d7   : >>> { %1478 = vrot.lane.b32.xlu0 %v3918_v32, %s3201_s11 }
 0x2d9   : >>> { %1442 = vrot.lane.b32.xlu1 %v1441_v33, %s3201_s11 }
 0x2db   : >>> { %1372 = vrot.lane.b32.xlu0 %v2919_v34, %s3201_s11 }
 0x2dd   : >>> { %1361 = vrot.lane.b32.xlu1 %v2915_v31, %s4302_s1 }
 0x2df   : >>> { %1463 = vrot.lane.b32.xlu0 %v1441_v33, %s4302_s1 }
 0x2e1   : >>> { %1408 = vrot.lane.b32.xlu1 %v3937_v35, %s3201_s11 }
 0x2e3   : >>> { %1510 = vrot.lane.b32.xlu0 %v3942_v36, %s3201_s11 }
 0x2e5   : >>> { %1474 = vrot.lane.b32.xlu1 %v2933_v37, %s3201_s11 }
 0x2e7   : >>> { %1404 = vrot.lane.b32.xlu0 %v2923_v38, %s3201_s11 }
 0x2e9   : >>> { %1393 = vrot.lane.b32.xlu1 %v2919_v34, %s4302_s1 }
 0x2eb   : >>> { %1506 = vrot.lane.b32.xlu0 %v2937_v39, %s3201_s11 }
 0x2ed   : >>> { %1495 = vrot.lane.b32.xlu1 %v2933_v37, %s4302_s1 }
 0x2ef   : >>> { %1425 = vrot.lane.b32.xlu0 %v2923_v38, %s4302_s1 }
 0x2f1   : >>> { %1542 = vrot.lane.b32.xlu1 %v3966_v40, %s3201_s11 }
 0x2f3   : >>> { %1538 = vrot.lane.b32.xlu0 %v2941_v41, %s3201_s11 }
 0x2f5   : >>> { %1527 = vrot.lane.b32.xlu1 %v2937_v39, %s4302_s1 }
 0x2f9   : >>> { %1559 = vrot.lane.b32.xlu1 %v2941_v41, %s4302_s1  ;;  %s4048_s1 = smov [#allocation12] }
 0x33b   : >>> { %v1309_v42 = vpop.permute.xlu1 %1308 }
 0x33d   : >>> { %v1313_v43 = vpop.permute.xlu0 %1312 }
 0x33e   : >>> { %v1317_v49 = vsel %vm1316_vm12, %v3885_v27, %v1313_v43 }
 0x33f   : >>> { %v1321_v48 = vsel %vm1320_vm15, %v1309_v42, %v1317_v49  ;;  %v1345_v45 = vpop.permute.xlu1 %1344 }
 0x340   : >>> { %v1327_v44 = vsel %vm2541_vm8, %v1321_v48, 0.0  ;;  %v1349_v52 = vsel %vm1316_vm12, %v3892_v28, %v1345_v45 }
 0x341   : >>> { %v1330_v46 = vpop.permute.xlu0 %1329  ;;  %1431 = vst [vmem:[%s3880_s17] sm:$0xff] %v1327_v44 }
 0x342   : >>> { %v1334_v47 = vsel %vm1333_vm0, %v3885_v27, %v1330_v46 }
 0x343   : >>> { %1432 = vst [vmem:[%s3877_s16] sm:$0xff] %v1334_v47  ;;  %v1447_v50 = vpop.permute.xlu1 %1446 }
 0x344   : >>> { %v1451_v57 = vsel %vm1316_vm12, %v3902_v29, %v1447_v50 }
 0x345   : >>> { %v1377_v51 = vpop.permute.xlu0 %1376 }
 0x346   : >>> { %v1381_v59 = vsel %vm1316_vm12, %v3907_v30, %v1377_v51 }
 0x347   : >>> { %v1341_v53 = vpop.permute.xlu1 %1340 }
 0x348   : >>> { %v1353_v54 = vsel %vm1320_vm15, %v1341_v53, %v1349_v52 }
 0x349   : >>> { %v1479_v55 = vpop.permute.xlu0 %1478  ;;  %v1359_v56 = vsel %vm2541_vm8, %v1353_v54, 0.0 }
 0x34a   : >>> { %2927 = vst [vmem:[%s3887_s27 + $0x8] sm:$0xff] %v1359_v56  ;;  %v1483_v7 = vsel %vm1316_vm12, %v3918_v32, %v1479_v55 }
 0x34b   : >>> { %v1443_v58 = vpop.permute.xlu1 %1442 }
 0x34c   : >>> { %v1455_v60 = vsel %vm1320_vm15, %v1443_v58, %v1451_v57 }
 0x34d   : >>> { %v1373_v61 = vpop.permute.xlu0 %1372  ;;  %v1461_v62 = vsel %vm2541_vm8, %v1455_v60, 0.0 }
 0x34e   : >>> { %v1385_v63 = vsel %vm1320_vm15, %v1373_v61, %v1381_v59  ;;  %1565 = vst [vmem:[%s3896_s30] sm:$0xff] %v1461_v62 }
 0x34f   : >>> { %v1391_v0 = vsel %vm2541_vm8, %v1385_v63, 0.0  ;;  %v1362_v1 = vpop.permute.xlu1 %1361 }
 0x350   : >>> { %2929 = vst [vmem:[%s3899_s29 + $0x10] sm:$0xff] %v1391_v0  ;;  %v1366_v2 = vsel %vm1333_vm0, %v3892_v28, %v1362_v1 }
 0x351   : >>> { %v1464_v3 = vpop.permute.xlu0 %1463  ;;  %2928 = vst [vmem:[%s3909_s20 + $0x8] sm:$0xff] %v1366_v2 }
 0x352   : >>> { %v1468_v4 = vsel %vm1333_vm0, %v3902_v29, %v1464_v3 }
 0x353   : >>> { %1566 = vst [vmem:[%s3920_s22] sm:$0xff] %v1468_v4  ;;  %v1409_v5 = vpop.permute.xlu1 %1408 }
 0x354   : >>> { %v1413_v9 = vsel %vm1316_vm12, %v3937_v35, %v1409_v5 }
 0x355   : >>> { %v1511_v6 = vpop.permute.xlu0 %1510 }
 0x356   : >>> { %v1515_v16 = vsel %vm1316_vm12, %v3942_v36, %v1511_v6 }
 0x357   : >>> { %v1475_v8 = vpop.permute.xlu1 %1474 }
 0x358   : >>> { %v1487_v10 = vsel %vm1320_vm15, %v1475_v8, %v1483_v7 }
 0x359   : >>> { %v1405_v11 = vpop.permute.xlu0 %1404  ;;  %v1493_v12 = vsel %vm2541_vm8, %v1487_v10, 0.0 }
 0x35a   : >>> { %v1417_v13 = vsel %vm1320_vm15, %v1405_v11, %v1413_v9  ;;  %2945 = vst [vmem:[%s3913_s21 + $0x8] sm:$0xff] %v1493_v12 }
 0x35b   : >>> { %v1423_v14 = vsel %vm2541_vm8, %v1417_v13, 0.0  ;;  %v1394_v15 = vpop.permute.xlu1 %1393 }
 0x35c   : >>> { %2931 = vst [vmem:[%s3931_s2 + $0x18] sm:$0xff] %v1423_v14  ;;  %v1398_v18 = vsel %vm1333_vm0, %v3907_v30, %v1394_v15  ;;  %s4093_s2 = smov [#allocation14] }
 0x35d   : >>> { %v1507_v19 = vpop.permute.xlu0 %1506  ;;  %2930 = vst [vmem:[%s3924_s0 + $0x10] sm:$0xff] %v1398_v18  ;;  %s4084_s0 = smov [#allocation13] }
 0x35e   : >>> { %v1519_v20 = vsel %vm1320_vm15, %v1507_v19, %v1515_v16 }
 0x35f   : >>> { %v1525_v21 = vsel %vm2541_vm8, %v1519_v20, 0.0  ;;  %v1496_v22 = vpop.permute.xlu1 %1495 }
 0x360   : >>> { %2947 = vst [vmem:[%s3934_s3 + $0x10] sm:$0xff] %v1525_v21  ;;  %v1500_v23 = vsel %vm1333_vm0, %v3918_v32, %v1496_v22  ;;  %s1658_s3 = smov [#allocation15] }
 0x361   : >>> { %v1426_v25 = vpop.permute.xlu0 %1425  ;;  %2946 = vst [vmem:[%s3944_s18 + $0x8] sm:$0xff] %v1500_v23  ;;  %s555_s18 = smov (%p624_p9), [#allocation15] }
 0x362   : >>> { %v1430_v26 = vsel %vm1333_vm0, %v3937_v35, %v1426_v25 }
 0x363   : >>> { %2932 = vst [vmem:[%s3948_s10 + $0x18] sm:$0xff] %v1430_v26  ;;  %v1575_v27 = vld [vmem:[%s4048_s1] ss:$0 sm:$0xff]  ;;  %v2952_v29 = vld [vmem:[%s4048_s1 + $0x7] ss:$0 sm:$0xff]  ;;  %v1543_v34 = vpop.permute.xlu1 %1542  ;;  %s485_s10 = smov (%p624_p9), [#allocation13] }
 0x364   : >>> { %v2951_v28 = vld [vmem:[%s4048_s1 - $0x1] sm:$0xfe]  ;;  %v2953_v31 = vld [vmem:[%s4048_s1 + $0x7] sm:$0xfe]  ;;  %v2954_v32 = vld [vmem:[%s4048_s1 + $0xf] ss:$0 sm:$0xff]  ;;  %v1547_v42 = vsel %vm1316_vm12, %v3966_v40, %v1543_v34 }
 0x365   : >>> { %v1582_v30 = vsel %vm1581_vm11, %v1575_v27, %v2951_v28  ;;  %v2956_v33 = vld [vmem:[%s4048_s1 + $0xf] sm:$0xfe]  ;;  %v1593_v37 = vsel %vm1581_vm11, %v2952_v29, %v2953_v31  ;;  %v2957_v38 = vld [vmem:[%s4048_s1 + $0x17] ss:$0 sm:$0xff]  ;;  %v2959_v39 = vld [vmem:[%s4048_s1 + $0x17] sm:$0xfe]  ;;  %v1539_v43 = vpop.permute.xlu0 %1538 }
 0x366   : >>> { %1585 = vst [vmem:[%s4048_s1] sm:$0xff] %v1582_v30  ;;  %v1604_v35 = vsel %vm1581_vm11, %v2954_v32, %v2956_v33  ;;  %v2960_v41 = vld [vmem:[%s4048_s1 + $0x1f] ss:$0 sm:$0xff]  ;;  %2955 = vst [vmem:[%s4048_s1 + $0x8] sm:$0xff] %v1593_v37  ;;  %v1615_v49 = vsel %vm1581_vm11, %v2957_v38, %v2959_v39  ;;  %v1551_v48 = vsel %vm1320_vm15, %v1539_v43, %v1547_v42 }
 0x367   : >>> { %2958 = vst [vmem:[%s4048_s1 + $0x10] sm:$0xff] %v1604_v35  ;;  %2961 = vst [vmem:[%s4048_s1 + $0x18] sm:$0xff] %v1615_v49  ;;  %v1557_v44 = vsel %vm2541_vm8, %v1551_v48, 0.0  ;;  %v1528_v45 = vpop.permute.xlu1 %1527  ;;  %v454_v49 = vadd.s32 (%p624_p9), 8, %v435_v17 }
 0x368   : >>> { %2949 = vst [vmem:[%s3960_s9 + $0x18] sm:$0xff] %v1557_v44  ;;  %v1532_v46 = vsel %vm1333_vm0, %v3942_v36, %v1528_v45  ;;  %s436_s9 = smov (%p624_p9), [#allocation12] }
 0x369   : >>> { %2948 = vst [vmem:[%s3954_s13 + $0x10] sm:$0xff] %v1532_v46  ;;  %s4171_s13 = smov (%p624_p9), [#allocation14]  ;;  %vm455_vm10 = vcmp.eq.s32.totalorder (%p624_p9), %v454_v49, %v432_v24 }
 0x36a   : >>> { %v1659_v47 = vld [vmem:[%s4084_s0] ss:$0 sm:$0xff]  ;;  %v2974_v51 = vld [vmem:[%s4084_s0 + $0x7] ss:$0 sm:$0xff]  ;;  %v2975_v53 = vld [vmem:[%s4084_s0 + $0x7] sm:$0xfe] }
 0x36b   : >>> { %v2973_v50 = vld [vmem:[%s4084_s0 - $0x1] sm:$0xfe]  ;;  %v2976_v54 = vld [vmem:[%s4084_s0 + $0xf] ss:$0 sm:$0xff]  ;;  %v2978_v55 = vld [vmem:[%s4084_s0 + $0xf] sm:$0xfe]  ;;  %v1677_v36 = vsel %vm1581_vm11, %v2974_v51, %v2975_v53  ;;  %v1560_v60 = vpop.permute.xlu1 %1559 }
 0x36c   : >>> { %v1666_v52 = vsel %vm1581_vm11, %v1659_v47, %v2973_v50  ;;  %v1688_v56 = vsel %vm1581_vm11, %v2976_v54, %v2978_v55  ;;  %v2979_v57 = vld [vmem:[%s4084_s0 + $0x17] ss:$0 sm:$0xff]  ;;  %v2981_v58 = vld [vmem:[%s4084_s0 + $0x17] sm:$0xfe]  ;;  %v2982_v59 = vld [vmem:[%s4084_s0 + $0x1f] ss:$0 sm:$0xff]  ;;  %v1564_v62 = vsel %vm1333_vm0, %v3966_v40, %v1560_v60 }
 0x36d   : >>> { %1669 = vst [vmem:[%s4084_s0] sm:$0xff] %v1666_v52  ;;  %2977 = vst [vmem:[%s4084_s0 + $0x8] sm:$0xff] %v1677_v36  ;;  %v1699_v61 = vsel %vm1581_vm11, %v2979_v57, %v2981_v58  ;;  %v474_v60 = vadd.s32 (%p624_p9), 24, %v435_v17 }
 0x36e   : >>> { %2980 = vst [vmem:[%s4084_s0 + $0x10] sm:$0xff] %v1688_v56  ;;  %2983 = vst [vmem:[%s4084_s0 + $0x18] sm:$0xff] %v1699_v61 }
 0x36f   : >>> { %2950 = vst [vmem:[%s3963_s8 + $0x18] sm:$0xff] %v1564_v62  ;;  %v1619_v63 = vld [vmem:[%s4093_s2] ss:$0 sm:$0xff]  ;;  %v2963_v0 = vld [vmem:[%s4093_s2 + $0x19] sm:$0x7f]  ;;  %vm4304_vm11 = vmmov %vm4303_vm1  ;;  %s2039_s8 = sadd.s32 (%p624_p9), 1, %s3194_s25   ;;  %vm475_vm14 = vcmp.eq.s32.totalorder (%p624_p9), %v474_v60, %v432_v24 }
 0x370   : >>> { %v2964_v1 = vld [vmem:[%s4093_s2 + $0x18] ss:$0 sm:$0xff]  ;;  %2962 = vst [vmem:[%s4048_s1 + $0x1] sm:$0x1] %v1619_v63  ;;  %v1628_v2 = vsel %vm4303_vm1, %v2960_v41, %v2963_v0  ;;  %v2966_v3 = vld [vmem:[%s4093_s2 + $0x11] sm:$0x7f]  ;;  %s4311_s25 = smov (%p624_p9), %s2039_s8 }
 0x371   : >>> { %v2967_v4 = vld [vmem:[%s4093_s2 + $0x10] ss:$0 sm:$0xff]  ;;  %v2969_v5 = vld [vmem:[%s4093_s2 + $0x9] sm:$0x7f]  ;;  %2965 = vst [vmem:[%s4093_s2 + $0x18] sm:$0xff] %v1628_v2  ;;  %v1637_v40 = vsel %vm4304_vm11, %v2964_v1, %v2966_v3  ;;  %p620_p10 = scmp.ge.s32.totalorder (%p624_p9), %s2039_s8, 15 }
 0x372   : >>> { %v1646_v6 = vsel %vm4305_vm2, %v2967_v4, %v2969_v5  ;;  %v2970_v7 = vld [vmem:[%s4093_s2 + $0x8] ss:$0 sm:$0xff]  ;;  %v2972_v8 = vld [vmem:[%s4093_s2 + $0x1] sm:$0x7f]  ;;  %2968 = vst [vmem:[%s4093_s2 + $0x10] sm:$0xff] %v1637_v40 }
 0x373   : >>> { %2971 = vst [vmem:[%s4093_s2 + $0x8] sm:$0xff] %v1646_v6  ;;  %v1654_v9 = vsel %vm4306_vm3, %v2970_v7, %v2972_v8 }
 0x374   : >>> { %1656 = vst [vmem:[%s4093_s2] sm:$0xff] %v1654_v9 }
 0x375   : >> { %626 = sbr.rel (!%p624_p9) target bundleno = 323 (0x143), region = 581 }
 0x376   : >>> { %v1703_v10 = vld [vmem:[%s1658_s3] ss:$0 sm:$0xff]  ;;  %v2985_v11 = vld [vmem:[%s1658_s3 + $0x19] sm:$0x7f]  ;;  %v2986_v12 = vld [vmem:[%s1658_s3 + $0x18] ss:$0 sm:$0xff] }
 0x377   : >>> { %2984 = vst [vmem:[%s4084_s0 + $0x1] sm:$0x1] %v1703_v10  ;;  %v1712_v13 = vsel %vm4307_vm4, %v2982_v59, %v2985_v11  ;;  %v2988_v14 = vld [vmem:[%s1658_s3 + $0x11] sm:$0x7f]  ;;  %v2989_v15 = vld [vmem:[%s1658_s3 + $0x10] ss:$0 sm:$0xff] }
 0x378   : >>> { %v2991_v16 = vld [vmem:[%s1658_s3 + $0x9] sm:$0x7f]  ;;  %2987 = vst [vmem:[%s1658_s3 + $0x18] sm:$0xff] %v1712_v13  ;;  %v1721_v18 = vsel %vm4308_vm5, %v2986_v12, %v2988_v14  ;;  %v2992_v20 = vld [vmem:[%s1658_s3 + $0x8] ss:$0 sm:$0xff]  ;;  %v442_v23 = vld [vmem:[%s436_s9] sm:$0xff] (%p624_p9) }
 0x379   : >>> { %v1730_v19 = vsel %vm4309_vm6, %v2989_v15, %v2991_v16  ;;  %v2994_v21 = vld [vmem:[%s1658_s3 + $0x1] sm:$0x7f]  ;;  %2990 = vst [vmem:[%s1658_s3 + $0x10] sm:$0xff] %v1721_v18  ;;  %v3069_v25 = vld [vmem:[%s436_s9 + $0x8] sm:$0xff] (%p624_p9)  ;;  %v3070_v26 = vld [vmem:[%s436_s9 + $0x10] sm:$0xff] (%p624_p9)  ;;  %v443_v27 = vsel (%p624_p9), %vm2541_vm8, %v442_v23, 0.0 }
 0x37a   : >>> { %2993 = vst [vmem:[%s1658_s3 + $0x8] sm:$0xff] %v1730_v19  ;;  %v1738_v22 = vsel %vm4310_vm7, %v2992_v20, %v2994_v21  ;;  %v451_v28 = vsel (%p624_p9), %vm2541_vm8, %v3069_v25, 0.0  ;;  %v461_v29 = vsel (%p624_p9), %vm2541_vm8, %v3070_v26, 0.0  ;;  %v3071_v30 = vld [vmem:[%s436_s9 + $0x18] sm:$0xff] (%p624_p9)  ;;  %v444_v32 = vmul.f32 (%p624_p9), %v443_v27, %v443_v27 }
 0x37b   : >>> { %1740 = vst [vmem:[%s1658_s3] sm:$0xff] %v1738_v22  ;;  %v452_v33 = vmul.f32 (%p624_p9), %v451_v28, %v451_v28  ;;  %v462_v34 = vmul.f32 (%p624_p9), %v461_v29, %v461_v29  ;;  %v471_v37 = vsel (%p624_p9), %vm2541_vm8, %v3071_v30, 0.0  ;;  %v526_v51 = vld [vmem:[%s4171_s13] sm:$0xff] (%p624_p9)  ;;  %v3075_v53 = vld [vmem:[%s4171_s13 + $0x8] sm:$0xff] (%p624_p9)  ;;  %v464_v59 = vadd.s32 (%p624_p9), 16, %v435_v17  ;;  %v3076_v0 = vld [vmem:[%s4171_s13 + $0x10] sm:$0xff] (%p624_p9) }
 0x37c   : >> { %v472_v41 = vmul.f32 %v471_v37, %v471_v37  ;;  %v448_v54 = vsel %vm447_vm9, 0.0, %v444_v32  ;;  %v527_v57 = vsel %vm2541_vm8, %v526_v51, 0.0  ;;  %v533_v63 = vsel %vm2541_vm8, %v3075_v53, 0.0  ;;  %v3077_v3 = vld [vmem:[%s4171_s13 + $0x18] sm:$0xff] }
 0x37d   : >> { %v458_v39 = vadd.f32 %v452_v33, %v444_v32  ;;  %v456_v56 = vsel %vm455_vm10, 0.0, %v452_v33  ;;  %vm465_vm13 = vcmp.eq.s32.totalorder %v464_v59, %v432_v24  ;;  %v516_v24 = vmov %v3320_v24 }
 0x37e   : >> { %v491_v31 = vld [vmem:[%s485_s10] sm:$0xff]  ;;  %v3072_v35 = vld [vmem:[%s485_s10 + $0x8] sm:$0xff]  ;;  %v3073_v42 = vld [vmem:[%s485_s10 + $0x10] sm:$0xff]  ;;  %v457_v58 = vadd.f32 %v456_v56, %v448_v54  ;;  %v519_v17 = vmov %v3316_v17  ;;  %v528_v2 = vmul.f32 %v527_v57, %v527_v57  ;;  %v466_v4 = vsel %vm465_vm13, 0.0, %v462_v34 }
 0x37f   : >> { %v492_v38 = vsel %vm2541_vm8, %v491_v31, 0.0  ;;  %v498_v43 = vsel %vm2541_vm8, %v3072_v35, 0.0  ;;  %v468_v48 = vadd.f32 %v462_v34, %v458_v39  ;;  %v3074_v45 = vld [vmem:[%s485_s10 + $0x18] sm:$0xff]  ;;  %v504_v46 = vsel %vm2541_vm8, %v3073_v42, 0.0 }
 0x380   : >> { %v493_v44 = vmul.f32 %v492_v38, %v492_v38  ;;  %v499_v50 = vmul.f32 %v498_v43, %v498_v43  ;;  %v510_v52 = vsel %vm2541_vm8, %v3074_v45, 0.0  ;;  %v505_v36 = vmul.f32 %v504_v46, %v504_v46 }
 0x381   : >> { %v478_v47 = vadd.f32 %v472_v41, %v468_v48  ;;  %v511_v62 = vmul.f32 %v510_v52, %v510_v52  ;;  %v476_v5 = vsel %vm475_vm14, 0.0, %v472_v41  ;;  %v539_v40 = vsel %vm2541_vm8, %v3076_v0, 0.0 }
 0x382   : >> { %v467_v6 = vadd.f32 %v466_v4, %v457_v58  ;;  %v534_v8 = vmul.f32 %v533_v63, %v533_v63  ;;  %v561_v9 = vld [vmem:[%s555_s18] sm:$0xff]  ;;  %v545_v10 = vsel %vm2541_vm8, %v3077_v3, 0.0  ;;  %v540_v13 = vmul.f32 %v539_v40, %v539_v40  ;;  %v3078_v14 = vld [vmem:[%s555_s18 + $0x8] sm:$0xff]  ;;  %v3079_v20 = vld [vmem:[%s555_s18 + $0x10] sm:$0xff] }
 0x383   : >> { %v495_v55 = vadd.f32 %v493_v44, %v478_v47  ;;  %v562_v15 = vsel %vm2541_vm8, %v561_v9, 0.0  ;;  %v546_v19 = vmul.f32 %v545_v10, %v545_v10  ;;  %v572_v21 = vsel %vm2541_vm8, %v3078_v14, 0.0  ;;  %v3080_v26 = vld [vmem:[%s555_s18 + $0x18] sm:$0xff] }
 0x384   : >> { %v477_v11 = vadd.f32 %v476_v5, %v467_v6  ;;  %v563_v25 = vmul.f32 %v562_v15, %v562_v15  ;;  %v582_v27 = vsel %vm2541_vm8, %v3079_v20, 0.0  ;;  %v573_v30 = vmul.f32 %v572_v21, %v572_v21 }
 0x385   : >> { %v501_v61 = vadd.f32 %v499_v50, %v495_v55  ;;  %v554_v17 = vmov %v3316_v17  ;;  %v592_v31 = vsel %vm2541_vm8, %v3080_v26, 0.0  ;;  %v583_v34 = vmul.f32 %v582_v27, %v582_v27 }
 0x386   : >> { %v494_v16 = vadd.f32 %v493_v44, %v477_v11  ;;  %v551_v24 = vmov %v3320_v24  ;;  %v575_v35 = vadd.s32 8, %v554_v17  ;;  %v593_v39 = vmul.f32 %v592_v31, %v592_v31 }
 0x387   : >> { %v507_v1 = vadd.f32 %v505_v36, %v501_v61  ;;  %vm566_vm12 = vcmp.eq.s32.totalorder %v554_v17, %v551_v24  ;;  %v585_v42 = vadd.s32 16, %v554_v17  ;;  %v595_v48 = vadd.s32 24, %v554_v17 }
 0x388   : >> { %v500_v22 = vadd.f32 %v499_v50, %v494_v16  ;;  %vm576_vm15 = vcmp.eq.s32.totalorder %v575_v35, %v551_v24  ;;  %v567_v45 = vsel %vm566_vm12, 0.0, %v563_v25 }
 0x389   : >> { %v513_v7 = vadd.f32 %v511_v62, %v507_v1  ;;  %vm586_vm0 = vcmp.eq.s32.totalorder %v585_v42, %v551_v24  ;;  %v577_v47 = vsel %vm576_vm15, 0.0, %v573_v30  ;;  %vm596_vm1 = vcmp.eq.s32.totalorder %v595_v48, %v551_v24 }
 0x38a   : >> { %v506_v28 = vadd.f32 %v505_v36, %v500_v22  ;;  %v587_v51 = vsel %vm586_vm0, 0.0, %v583_v34  ;;  %v597_v53 = vsel %vm596_vm1, 0.0, %v593_v39 }
 0x38b   : >> { %v530_v12 = vadd.f32 %v528_v2, %v513_v7 }
 0x38c   : >> { %v512_v32 = vadd.f32 %v511_v62, %v506_v28 }
 0x38d   : >> { %v536_v18 = vadd.f32 %v534_v8, %v530_v12 }
 0x38e   : >> { %v529_v37 = vadd.f32 %v528_v2, %v512_v32 }
 0x38f   : >> { %v542_v23 = vadd.f32 %v540_v13, %v536_v18 }
 0x390   : >> { %v535_v41 = vadd.f32 %v534_v8, %v529_v37 }
 0x391   : >> { %v548_v29 = vadd.f32 %v546_v19, %v542_v23 }
 0x392   : >> { %v541_v49 = vadd.f32 %v540_v13, %v535_v41 }
 0x393   : >> { %v569_v33 = vadd.f32 %v563_v25, %v548_v29 }
 0x394   : >> { %v547_v46 = vadd.f32 %v546_v19, %v541_v49 }
 0x395   : >> { %v579_v38 = vadd.f32 %v573_v30, %v569_v33 }
 0x396   : >> { %v568_v50 = vadd.f32 %v567_v45, %v547_v46 }
 0x397   : >> { %v589_v43 = vadd.f32 %v583_v34, %v579_v38 }
 0x398   : >> { %v578_v52 = vadd.f32 %v577_v47, %v568_v50 }
 0x399   : >> { %v599_v44 = vadd.f32 %v593_v39, %v589_v43 }
 0x39a   : >> { %v588_v54 = vadd.f32 %v587_v51, %v578_v52 }
 0x39b   : >> { %600 = vadd.xlane.f32.xlu0 %v599_v44 }
 0x39c   : >> { %v598_v55 = vadd.f32 %v597_v53, %v588_v54 }
 0x39f   : >> { %608 = vadd.xlane.f32.xlu0 %v598_v55 }
 0x428   : >> { %v601_v36 = vpop.xlane.xlu0 %600 }
 0x429   : >> { %v602_v56 = vrot.slane %v601_v36, 4 }
 0x42b   : >> { %v603_v57 = vadd.f32 %v602_v56, %v601_v36 }
 0x42c   : >> { %v609_v59 = vpop.xlane.xlu0 %608 }
 0x42d   : >> { %v604_v58 = vrot.slane %v603_v57, 2  ;;  %v610_v60 = vrot.slane %v609_v59, 4 }
 0x42f   : >> { %v611_v61 = vadd.f32 %v610_v60, %v609_v59  ;;  %v605_v62 = vadd.f32 %v604_v58, %v603_v57 }
 0x431   : >> { %v612_v63 = vrot.slane %v611_v61, 2  ;;  %v606_v1 = vrot.slane %v605_v62, 1 }
 0x433   : >> { %v613_v0 = vadd.f32 %v612_v63, %v611_v61  ;;  %v607_v4 = vadd.f32 %v606_v1, %v605_v62 }
 0x435   : >> { %v614_v2 = vrot.slane %v613_v0, 1 }
 0x437   : >> { %v615_v3 = vadd.f32 %v614_v2, %v613_v0 }
 0x439   : >> { %3105 = vpush %v615_v3 }
 0x43a   : >> { %3107 = vpush %v607_v4 }
 0x46a   : >> { %s3106_s21 = spop %3105 }
 0x46b   : >> { %s3108_s26 = spop %3107 }
 0x46c   : >> { %s618_s16 = smul.f32 1e-10, %s3108_s26 }
 0x46e   : >> { %p619_p11 = scmp.le.f32.partialorder %s3106_s21, %s618_s16 }
 0x470   : >> { %p621_p12 = por %p620_p10, %p619_p11 }
 0x472   : > { %2041 = sbr.rel (!%p621_p12) target bundleno = 322 (0x142), region = 592 }
 0x479 PF: > { %s2046_s17 = smov [#allocation12]  ;;  %v2050_v24 = vmov %v3320_v24  ;;  %v2053_v17 = vmov %v3316_v17  ;;  %s2084_s25 = smov [#allocation15] }
 0x47a   : > { %v2088_v24 = vmov %v3320_v24  ;;  %v2091_v17 = vmov %v3316_v17  ;;  %v2054_v5 = vld [vmem:[%s2046_s17] sm:$0xff]  ;;  %vm2057_vm11 = vcmp.eq.s32.totalorder %v2053_v17, %v2050_v24  ;;  %v3081_v40 = vld [vmem:[%s2046_s17 + $0x8] sm:$0xff]  ;;  %v2062_v6 = vadd.s32 8, %v2053_v17  ;;  %v3082_v8 = vld [vmem:[%s2046_s17 + $0x10] sm:$0xff]  ;;  %s2042_s11 = sand.u32 7, %s3269_s12   ;;  %s4312_s22 = scalar_lea.vmem [#allocation5], %s3314_s28 }
 0x47b   : > { %vm2095_vm2 = vcmp.eq.s32.totalorder %v2091_v17, %v2088_v24  ;;  %v2058_v7 = vsel %vm2057_vm11, %v2054_v5, 0.0  ;;  %v2068_v9 = vadd.s32 16, %v2053_v17  ;;  %v2074_v10 = vadd.s32 24, %v2053_v17  ;;  %v3083_v12 = vld [vmem:[%s2046_s17 + $0x18] sm:$0xff]  ;;  %v2092_v13 = vld [vmem:[%s2084_s25] sm:$0xff]  ;;  %v3084_v14 = vld [vmem:[%s2084_s25 + $0x8] sm:$0xff] }
 0x47c   : > { %v2100_v11 = vadd.s32 8, %v2091_v17  ;;  %vm2063_vm8 = vcmp.eq.s32.totalorder %v2062_v6, %v2050_v24  ;;  %v2106_v15 = vadd.s32 16, %v2091_v17  ;;  %v2112_v16 = vadd.s32 24, %v2091_v17  ;;  %v3085_v20 = vld [vmem:[%s2084_s25 + $0x10] sm:$0xff]  ;;  %v3086_v22 = vld [vmem:[%s2084_s25 + $0x18] sm:$0xff]  ;;  %s2043_s27 = scalar_lea.vmem [#allocation4], %s2042_s11 }
 0x47d   : > { %v2064_v18 = vsel %vm2063_vm8, %v3081_v40, %v2058_v7  ;;  %vm2069_vm3 = vcmp.eq.s32.totalorder %v2068_v9, %v2050_v24  ;;  %vm2075_vm4 = vcmp.eq.s32.totalorder %v2074_v10, %v2050_v24  ;;  %v2096_v19 = vsel %vm2095_vm2, %v2092_v13, 0.0  ;;  %s2047_s27 = smov %s2043_s27  ;;  %s2045_s30 = scalar_lea.vmem [#allocation6], %s2042_s11 }
 0x47e   : > { %v2070_v21 = vsel %vm2069_vm3, %v3082_v8, %v2064_v18  ;;  %vm2101_vm5 = vcmp.eq.s32.totalorder %v2100_v11, %v2088_v24  ;;  %vm2107_vm6 = vcmp.eq.s32.totalorder %v2106_v15, %v2088_v24  ;;  %vm2113_vm7 = vcmp.eq.s32.totalorder %v2112_v16, %v2088_v24  ;;  %s2085_s30 = smov %s2045_s30  ;;  %s4313_s29 = scalar_lea.vmem [#allocation7], %s3314_s28 }
 0x47f   : > { %v2076_v23 = vsel %vm2075_vm4, %v3083_v12, %v2070_v21  ;;  %v2102_v25 = vsel %vm2101_vm5, %v3084_v14, %v2096_v19  ;;  %s2161_s20 = sshrl.u32 (%p3283_p3), %s3269_s12, 3  ;;  %s4314_s1 = scalar_lea.vmem (%p3283_p3), [#allocation5], %s3314_s28 }
 0x480   : > { %v2077_v26 = vrot.slane %v2076_v23, 4  ;;  %v2108_v27 = vsel %vm2107_vm6, %v3085_v20, %v2102_v25  ;;  %s3093_s0 = sshll.u32 (%p3283_p3), %s2161_s20, 1 }
 0x481   : > { %v2114_v28 = vsel %vm2113_vm7, %v3086_v22, %v2108_v27  ;;  %s2163_s8 = scalar_lea.vmem (%p3283_p3), %s4276_s4, %s3093_s0 }
 0x482   : > { %v2078_v29 = vadd.f32 %v2077_v26, %v2076_v23  ;;  %v2115_v30 = vrot.slane %v2114_v28, 4 }
 0x484   : > { %v2079_v31 = vrot.slane %v2078_v29, 2  ;;  %v2116_v32 = vadd.f32 %v2115_v30, %v2114_v28 }
 0x486   : > { %v2080_v33 = vadd.f32 %v2079_v31, %v2078_v29  ;;  %v2117_v17 = vrot.slane %v2116_v32, 2 }
 0x488   : > { %v2081_v34 = vrot.slane %v2080_v33, 1  ;;  %v2118_v37 = vadd.f32 %v2117_v17, %v2116_v32 }
 0x48a   : > { %v2082_v35 = vadd.f32 %v2081_v34, %v2080_v33  ;;  %v2119_v24 = vrot.slane %v2118_v37, 1 }
 0x48c   : > { %2083 = vst [vmem:[%s2047_s27] sm:$0x1] %v2082_v35  ;;  %v2120_v38 = vadd.f32 %v2119_v24, %v2118_v37 }
 0x48e   : > { %2121 = vst [vmem:[%s2085_s30] sm:$0x1] %v2120_v38 }
 0x490   : > { %2160 = sbr.rel (!%p3283_p3) target bundleno = 1181 (0x49d), region = 114 }
 0x493   : > { %v2125_v39 = vld [vmem:[#allocation4] sm:$0x3] }
 0x494   : > { %2127 = vst [vmem:[%s4312_s22] sm:$0x3] %v2125_v39 }
 0x495   : > { %v2131_v41 = vld [vmem:[#allocation6] sm:$0x3] }
 0x496   : > { %2133 = vst [vmem:[%s4313_s29] sm:$0x3] %v2131_v41 }
 0x49b   : > { %v2179_v42 = vld [vmem:[%s4314_s1] sm:$0x3] }
 0x49c   : > { %2180 = vst [vmem:[%s2163_s8] sm:$0x3] %v2179_v42 }
 0x49d PF: > { %2197 = sbr.rel (!%p3283_p3) target bundleno = 1189 (0x4a5), region = 148  ;;  %s2198_s9 = sshrl.u32 (%p3283_p3), %s3269_s12, 3 }
 0x49e   : > { %s4315_s10 = scalar_lea.vmem (%p3283_p3), [#allocation7], %s3314_s28  ;;  %s3094_s13 = sshll.u32 (%p3283_p3), %s2198_s9, 1 }
 0x49f   : > { %s2200_s26 = scalar_lea.vmem (%p3283_p3), %s4277_s5, %s3094_s13 }
 0x4a3   : > { %v2216_v43 = vld [vmem:[%s4315_s10] sm:$0x3] (%p3283_p3) }
 0x4a4   : > { %2217 = vst [vmem:[%s2200_s26] sm:$0x3] %v2216_v43 }
 0x4a5 PF: > { %s3095_s19 = sshll.u32 %s3269_s12, 5  ;;  %v2246_v49 = vld [vmem:[%s3330_s14] sm:$0xff]  ;;  %v2248_v48 = vld [vmem:[%s3330_s14 + $0x8] sm:$0xff]  ;;  %v2250_v44 = vld [vmem:[%s3330_s14 + $0x10] sm:$0xff]  ;;  %s4316_s30 = sld [smem:[#allocation32_spill]] }
 0x4a6   : > { %s2233_s17 = scalar_lea.vmem %s4278_s6, %s3095_s19  ;;  %v2252_v45 = vld [vmem:[%s3330_s14 + $0x18] sm:$0xff]  ;;  %s2258_s27 = scalar_lea.vmem %s4279_s7, %s3095_s19  ;;  %v2271_v46 = vld [vmem:[%s3337_s15] sm:$0xff]  ;;  %v2273_v47 = vld [vmem:[%s3337_s15 + $0x8] sm:$0xff] }
 0x4a7   : > { %2247 = vst [vmem:[%s2233_s17] sm:$0xff] %v2246_v49  ;;  %2249 = vst [vmem:[%s2233_s17 + $0x8] sm:$0xff] %v2248_v48  ;;  %v2275_v50 = vld [vmem:[%s3337_s15 + $0x10] sm:$0xff]  ;;  %v2277_v51 = vld [vmem:[%s3337_s15 + $0x18] sm:$0xff]  ;;  %s4317_s1 = sld [smem:[#allocation33_spill]] }
 0x4a8   : > { %2251 = vst [vmem:[%s2233_s17 + $0x10] sm:$0xff] %v2250_v44  ;;  %2253 = vst [vmem:[%s2233_s17 + $0x18] sm:$0xff] %v2252_v45  ;;  %v2296_v52 = vld [vmem:[%s3346_s23] sm:$0xff]  ;;  %v2298_v53 = vld [vmem:[%s3346_s23 + $0x8] sm:$0xff] }
 0x4a9   : > { %2272 = vst [vmem:[%s2258_s27] sm:$0xff] %v2271_v46  ;;  %2274 = vst [vmem:[%s2258_s27 + $0x8] sm:$0xff] %v2273_v47  ;;  %v2300_v54 = vld [vmem:[%s3346_s23 + $0x10] sm:$0xff]  ;;  %v2302_v55 = vld [vmem:[%s3346_s23 + $0x18] sm:$0xff] }
 0x4aa   : > { %2276 = vst [vmem:[%s2258_s27 + $0x10] sm:$0xff] %v2275_v50  ;;  %2278 = vst [vmem:[%s2258_s27 + $0x18] sm:$0xff] %v2277_v51  ;;  %v2321_v36 = vld [vmem:[%s3353_s24] sm:$0xff]  ;;  %v2323_v56 = vld [vmem:[%s3353_s24 + $0x8] sm:$0xff] }
 0x4ab   : > { %s2283_s22 = scalar_lea.vmem %s4316_s30, %s3095_s19  ;;  %v2325_v57 = vld [vmem:[%s3353_s24 + $0x10] sm:$0xff]  ;;  %v2327_v58 = vld [vmem:[%s3353_s24 + $0x18] sm:$0xff] }
 0x4ac   : > { %2297 = vst [vmem:[%s2283_s22] sm:$0xff] %v2296_v52  ;;  %2299 = vst [vmem:[%s2283_s22 + $0x8] sm:$0xff] %v2298_v53 }
 0x4ad   : > { %s2308_s0 = scalar_lea.vmem %s4317_s1, %s3095_s19  ;;  %2301 = vst [vmem:[%s2283_s22 + $0x10] sm:$0xff] %v2300_v54  ;;  %2303 = vst [vmem:[%s2283_s22 + $0x18] sm:$0xff] %v2302_v55 }
 0x4ae   : > { %2322 = vst [vmem:[%s2308_s0] sm:$0xff] %v2321_v36  ;;  %2324 = vst [vmem:[%s2308_s0 + $0x8] sm:$0xff] %v2323_v56 }
 0x4af   : > { %2326 = vst [vmem:[%s2308_s0 + $0x10] sm:$0xff] %v2325_v57  ;;  %2328 = vst [vmem:[%s2308_s0 + $0x18] sm:$0xff] %v2327_v58 }
 0x4b0 PF: > { %s4318_s11 = sld [smem:[#allocation26_spill]]  ;;  %s4319_s30 = sld [smem:[#allocation25_spill]] }
 0x4b1   : > { %s4320_s10 = sld [smem:[#allocation27_spill]] }
 0x4b6   : > { %p13_p13 = scmp.ge.s32.totalorder %s4318_s11, 4  }
 0x4b8   :  { %15 = sbr.rel (!%p13_p13) target bundleno = 9 (0x9), region = 603 }

// kernel: pca_forward.2
= control target key start
LH: loop header
LB: loop body
LE: loop exit
PB: predicated region body
PF: predicated region fallthrough
CT: control target
= control target key end

     0   :  { %s450_s6 = smov 0   ;;  %s528_s0 = inlined_call_operand.vmem [shape: f32[2,64,32], index: 0, kind: input, shape index: {}]   ;;  %s529_s1 = inlined_call_operand.vmem [shape: f32[2,64,64], index: 1, kind: output, shape index: {}]  }
   0x1 LB: > { %s319_s7 = sadd.s32 4294967295, %s438_s6   ;;  %p323_p0 = scmp.ge.s32.totalorder %s438_s6, 1  ;;  %s438_s6 = sphi %s450_s6, %s11_s6  }
   0x2   : > { %p87_p1 = scmp.lt.s32.totalorder %s438_s6, 3 }
   0x4   : > { %p88_p2 = pnand %p323_p0, %p87_p1 }
   0x5   : > { %p107_p3 = scmp.lt.s32.totalorder (!%p88_p2), %s319_s7, 1  ;;  %vm125_vm0 = vcmask (!%p88_p2), 261120   ;;  %vm255_vm2 = vcmask (!%p88_p2), 523264  }
   0x6   : > { %91 = sbr.rel (%p88_p2) target bundleno = 269 (0x10d), region = 24  ;;  %vm468_vm1 = vmpackc.low (!%p88_p2), %vm125_vm0, %vm125_vm0 }
   0xd   : > { %s533_s7 = smov (!%p107_p3, %s319_s7), 1 }
   0xe   : > { %s346_s8 = sshll.u32 %s533_s7, 6 }
   0xf   : > { %s111_s11 = scalar_lea.vmem %s528_s0, %s346_s8  ;;  %s116_s14 = scalar_lea.vmem %s529_s1, %s346_s8 }
  0x10   : > { %v117_v1 = vld [vmem:[%s111_s11] sm:$0xff]  ;;  %v118_v2 = vld [vmem:[%s111_s11 + $0x8] sm:$0xff]  ;;  %v119_v3 = vld [vmem:[%s111_s11 + $0x10] sm:$0xff] }
  0x11   : > { %v392_v4 = vpack.c.bf16 %v118_v2, %v117_v1  ;;  %v120_v5 = vld [vmem:[%s111_s11 + $0x18] sm:$0xff]  ;;  %v121_v6 = vld [vmem:[%s111_s11 + $0x20] sm:$0xff]  ;;  %380 = vmatprep.mubr.msk.f32.mxu0 %vm125_vm0, %v117_v1  ;;  %v122_v8 = vld [vmem:[%s111_s11 + $0x28] sm:$0xff] }
  0x12   : > { %v398_v7 = vpack.c.bf16 %v120_v5, %v119_v3  ;;  %386 = vmatprep.mubr.msk.f32.mxu1 %vm125_vm0, %v121_v6  ;;  %v404_v9 = vpack.c.bf16 %v122_v8, %v121_v6  ;;  %v123_v10 = vld [vmem:[%s111_s11 + $0x30] sm:$0xff]  ;;  %v124_v11 = vld [vmem:[%s111_s11 + $0x38] sm:$0xff] }
  0x13   : > { %394 = vmatprep.subr.msk.bf16.mxu0 %vm468_vm1, %v392_v4  ;;  %416 = vmatprep.subr.msk.bf16.mxu1 %vm468_vm1, %v392_v4  ;;  %v410_v12 = vpack.c.bf16 %v124_v11, %v123_v10 }
  0x14   : > { %397 = vmatpush3.bf16.xpose.msk.msra.mxu0 %vm468_vm1, %v392_v4  ;;  %420 = vmatpush3.bf16.xpose.msk.msra.mxu1 %vm468_vm1, %v392_v4 }
  0x15   : > { %400 = vmatprep.subr.msk.bf16.mxu0 %vm468_vm1, %v398_v7  ;;  %417 = vmatprep.subr.msk.bf16.mxu1 %vm468_vm1, %v398_v7 }
  0x1c   : > { %403 = vmatpush3.bf16.xpose.msk.msra.mxu0 %vm468_vm1, %v398_v7  ;;  %421 = vmatpush3.bf16.xpose.msk.msra.mxu1 %vm468_vm1, %v398_v7 }
  0x1d   : > { %406 = vmatprep.subr.msk.bf16.mxu0 %vm468_vm1, %v404_v9  ;;  %418 = vmatprep.subr.msk.bf16.mxu1 %vm468_vm1, %v404_v9 }
  0x24   : > { %409 = vmatpush3.bf16.xpose.msk.msra.mxu0 %vm468_vm1, %v404_v9  ;;  %422 = vmatpush3.bf16.xpose.msk.msra.mxu1 %vm468_vm1, %v404_v9 }
  0x25   : > { %412 = vmatprep.subr.msk.bf16.mxu0 %vm468_vm1, %v410_v12  ;;  %419 = vmatprep.subr.msk.bf16.mxu1 %vm468_vm1, %v410_v12 }
  0x2c   : > { %415 = vmatpush3.bf16.xpose.msk.msra.mxu0 %vm468_vm1, %v410_v12  ;;  %423 = vmatpush3.bf16.xpose.msk.msra.mxu1 %vm468_vm1, %v410_v12 }
  0x33   : > { %381 = vmatmul.mubr.msk.f32.vlgmr.msra.gmra.mrb[0].mxu0 %vm125_vm0, %v118_v2  ;;  %387 = vmatmul.mubr.msk.f32.vlgmr.msra.gmra.mrb[0].mxu1 %vm125_vm0, %v122_v8 }
  0x34   : > { %383 = vmatprep.mubr.msk.f32.mxu0 %vm125_vm0, %v119_v3  ;;  %389 = vmatprep.mubr.msk.f32.mxu1 %vm125_vm0, %v123_v10 }
  0x37   : > { %384 = vmatmul.mubr.msk.f32.gmra.mrb[2].mxu0 %vm125_vm0, %v120_v5  ;;  %390 = vmatmul.mubr.msk.f32.gmra.mrb[2].mxu1 %vm125_vm0, %v124_v11 }
 0x106   : > { %v382_v13 = vpop.f32.mrb[0].mxu0  ;;  %v388_v14 = vpop.f32.mrb[0].mxu1 }
 0x107   : > { %257 = vst.msk [vmem:[%s116_s14 + $0x8] sm:$0xff] %vm255_vm2, %v382_v13  ;;  %261 = vst.msk [vmem:[%s116_s14 + $0x28] sm:$0xff] %vm255_vm2, %v388_v14  ;;  %v216_v15 = vpop.f32.mrb[1].mxu0  ;;  %v236_v16 = vpop.f32.mrb[1].mxu1 }
 0x108   : > { %256 = vst.msk [vmem:[%s116_s14] sm:$0xff] %vm255_vm2, %v216_v15  ;;  %260 = vst.msk [vmem:[%s116_s14 + $0x20] sm:$0xff] %vm255_vm2, %v236_v16 }
 0x10a   : > { %v385_v17 = vpop.f32.mrb[2].mxu0  ;;  %v391_v18 = vpop.f32.mrb[2].mxu1 }
 0x10b   : > { %259 = vst.msk [vmem:[%s116_s14 + $0x18] sm:$0xff] %vm255_vm2, %v385_v17  ;;  %263 = vst.msk [vmem:[%s116_s14 + $0x38] sm:$0xff] %vm255_vm2, %v391_v18  ;;  %v226_v19 = vpop.f32.mrb[3].mxu0  ;;  %v246_v20 = vpop.f32.mrb[3].mxu1 }
 0x10c   : > { %258 = vst.msk [vmem:[%s116_s14 + $0x10] sm:$0xff] %vm255_vm2, %v226_v19  ;;  %262 = vst.msk [vmem:[%s116_s14 + $0x30] sm:$0xff] %vm255_vm2, %v246_v20 }
 0x10d PF: > { %s11_s6 = sadd.s32 1, %s438_s6  }
 0x10e   : > { %p8_p4 = scmp.ge.s32.totalorder %s11_s6, 4  }
 0x110   :  { %10 = sbr.rel (!%p8_p4) target bundleno = 1 (0x1), region = 54 }

// kernel: pca_forward.3
= control target key start
LH: loop header
LB: loop body
LE: loop exit
PB: predicated region body
PF: predicated region fallthrough
CT: control target
= control target key end

     0   :  { %vm16_vm0 = vcmask 2048   ;;  %v114_v2 = vmov 0   ;;  %s155_s0 = inlined_call_operand.vmem [shape: f32[2,3,64], index: 0, kind: input, shape index: {}]   ;;  %s156_s1 = inlined_call_operand.vmem [shape: f32[2,3,1], index: 1, kind: input, shape index: {}]   ;;  %s157_s2 = inlined_call_operand.hbm [shape: f32[2,64], index: 2, kind: output, shape index: {}]  }
   0x1   :  { %v14_v0 = vld [vmem:[%s156_s1] sm:$0x7]  ;;  %v15_v1 = vld [vmem:[%s156_s1 + $0x4] sm:$0x7]  ;;  %85 = vset.pattern.permute.xlu0 %v114_v2 }
   0x2   :  { %v17_v3 = vsel %vm16_vm0, %v14_v0, 0.0  ;;  %v24_v4 = vsel %vm16_vm0, %v15_v1, 0.0 }
   0x3   :  { %7 = vsyncpa [#allocation3], 0  ;;  %v18_v5 = vrot.slane %v17_v3, 4  ;;  %v25_v6 = vrot.slane %v24_v4, 4  ;;  %v12_v21 = vld [vmem:[%s155_s0] sm:$0x7] }
   0x4   :  { %vm47_vm1 = vcmask 518144   ;;  %v13_v24 = vld [vmem:[%s155_s0 + $0x4] sm:$0x7]  ;;  %s115_s16 = smov [#allocation2]   ;;  %vm64_vm2 = vcmask 1041409   ;;  %vm67_vm3 = vcmask 517120  }
   0x5   :  { %v19_v7 = vadd.f32 %v18_v5, %v17_v3  ;;  %v26_v8 = vadd.f32 %v25_v6, %v24_v4  ;;  %s75_s17 = sshll.u32 %s115_s16, 4  ;;  %s76_s17 = int_to_ptr.vmem [resolvable:$true] %s75_s17 }
   0x6   :  { %s90_s0 = scalar_lea.vmem %s76_s17, 32  ;;  %p95_p1 = scmp.lt.s32.totalorder %s76_s17, %s76_s17 }
   0x7   :  { %v20_v9 = vrot.slane %v19_v7, 2  ;;  %v27_v10 = vrot.slane %v26_v8, 2  ;;  %p91_p0 = scmp.ne.s32.totalorder %s76_s17, %s90_s0  ;;  %p96_p2 = scmp.lt.s32.totalorder %s90_s0, %s90_s0 }
   0x9   :  { %v21_v11 = vadd.f32 %v20_v9, %v19_v7  ;;  %v28_v12 = vadd.f32 %v27_v10, %v26_v8  ;;  %p97_p3 = por %p96_p2, %p95_p1 }
   0xb   :  { %v22_v13 = vrot.slane %v21_v11, 1  ;;  %v29_v14 = vrot.slane %v28_v12, 1  ;;  %p98_p4 = pnand %p97_p3, %p91_p0 }
   0xd   :  { %v23_v15 = vadd.f32 %v22_v13, %v21_v11  ;;  %v30_v16 = vadd.f32 %v29_v14, %v28_v12 }
   0xf   :  { %86 = vrcp.f32 %v23_v15 }
  0x10   :  { %88 = vrcp.f32 %v30_v16 }
  0x19   :  { %v87_v17 = vpop.eup %86 }
  0x1a   :  { %v89_v18 = vpop.eup %88  ;;  %v32_v19 = vmul.f32 %v87_v17, %v14_v0 }
  0x1b   :  { %v34_v20 = vmul.f32 %v89_v18, %v15_v1 }
  0x1c   :  { %37 = vperm.xlu0 %85, %v32_v19  }
  0x20   :  { %42 = vperm.xlu0 %85, %v34_v20  }
  0x9b   :  { %v38_v22 = vpop.permute.xlu0 %37 }
  0x9c   :  { %v45_v23 = vmul.f32 %v38_v22, %v12_v21 }
  0x9e   :  { %v48_v25 = vsel %vm47_vm1, %v45_v23, 0.0 }
  0x9f   :  { %v49_v26 = vrot.slane %v48_v25, 4  ;;  %v43_v27 = vpop.permute.xlu0 %42 }
  0xa0   :  { %v46_v28 = vmul.f32 %v43_v27, %v13_v24 }
  0xa1   :  { %v50_v29 = vadd.f32 %v49_v26, %v48_v25 }
  0xa2   :  { %v55_v30 = vsel %vm47_vm1, %v46_v28, 0.0 }
  0xa3   :  { %v51_v31 = vrot.slane %v50_v29, 2  ;;  %v56_v32 = vrot.slane %v55_v30, 4 }
  0xa5   :  { %v52_v33 = vadd.f32 %v51_v31, %v50_v29  ;;  %v57_v34 = vadd.f32 %v56_v32, %v55_v30 }
  0xa7   :  { %v58_v35 = vrot.slane %v57_v34, 2  ;;  %v53_v36 = vrot.slane %v52_v33, 1 }
  0xa9   :  { %v59_v37 = vadd.f32 %v58_v35, %v57_v34  ;;  %v54_v39 = vadd.f32 %v53_v36, %v52_v33 }
  0xab   :  { %v60_v38 = vrot.slane %v59_v37, 1 }
  0xad   :  { %v61_v40 = vadd.f32 %v60_v38, %v59_v37 }
  0xaf   :  { %v65_v41 = vsel %vm64_vm2, %v61_v40, %v54_v39 }
  0xb0   :  { %68 = vst.msk [vmem:[#allocation2] sm:$0x3] %vm67_vm3, %v65_v41 }
  0xb1   :  { %101 = shalt.err (!%p98_p4)
}
  0xb2   :  { %s102_s20 = scalar_lea.hbm %s157_s2, 32 }
  0xb3   :  { %p103_p5 = scmp.ne.s32.totalorder %s157_s2, %s102_s20  ;;  %p106_p6 = scmp.lt.u32.totalorder %s102_s20, %s157_s2 }
  0xb5   :  { %p108_p7 = pnand %p106_p6, %p103_p5 }
  0xb7   :  { %111 = shalt.err (!%p108_p7)
}
  0xb8   :  { %78 = dma.vmem_to_hbm [thread:$0]  %s76_s17, 32, %s157_s2, [#allocation3]  }
  0xb9   :  { %112 = dma.done.wait [#allocation3], 32  }
  0xba   :  { %113 = vsyncadd [#allocation3], 4294967264 }
  0xbb   :  { %82 = vsyncpa [#allocation3], 1 }

</bundles_post_ra>
